<compile_context>
chip_gen: v7x
topology: tpu7x:2x2x1
jax: 0.10.0
libtpu: 0.0.40
codegen_flags: <defaults>
</compile_context>

<pallas_src>
import jax
import jax.numpy as jnp
from jax.experimental import pallas as pl
from jax.experimental.pallas import tpu as pltpu


# ------------------------------- Pallas kernel -------------------------------

def _rgcn_seq_kernel(
    s_ref,        # (N, N)                      bf16, resident
    x_ref,        # (T, N, F_in)                bf16, resident
    h0_ref,       # (N, F_out)                  f32
    wbig_ref,     # (2F_in + 2F_out, 3F_out)    bf16  fused [Z|R|H~x] weights
    bbig_ref,     # (1, 3F_out)                 f32   fused gate biases
    whh_ref,      # (2F_out, F_out)             bf16  candidate H-path weights
    wl_ref,       # (F_out, 128 - F_out)        bf16  Linear(filters,4), lane-padded
    bl_ref,       # (1, 128 - F_out)            f32
    out_ref,      # (T, N, 128)                 f32   lanes [0:F_out]=H, [F_out:F_out+4]=y
):
    bf = jnp.bfloat16
    n_steps = x_ref.shape[0]
    n = s_ref.shape[0]
    f_out = h0_ref.shape[1]

    # ---- hoisted: loads + bias broadcasts, resident across the whole sequence ----
    S = s_ref[...]                                                     # bf16
    W_big = wbig_ref[...]
    W_hh = whh_ref[...]
    W_l = wl_ref[...]
    b_big = jnp.broadcast_to(bbig_ref[...], (n, bbig_ref.shape[1]))    # (N, 3F_out) f32
    b_l = jnp.broadcast_to(bl_ref[...], (n, bl_ref.shape[1]))          # (N, 128-F_out) f32

    def step(t, H):
        Hb = H.astype(bf)
        Xb = x_ref[t]                                                  # (N, F_in) bf16

        # One MXU call for both Chebyshev T1 propagations: S @ [H | X].
        SP = jnp.dot(S, jnp.concatenate([Hb, Xb], axis=1),
                     preferred_element_type=jnp.float32)               # (N, F_out+F_in)

        # One wide matmul -> Z | R | (x-part of H~), all gate biases pre-fused.
        big = jnp.concatenate([Xb, SP.astype(bf), Hb], axis=1)         # (N, 2F_in+2F_out)
        g = jnp.dot(big, W_big, preferred_element_type=jnp.float32) + b_big

        ZR = jax.nn.sigmoid(g[:, : 2 * f_out])                         # packed Z|R sigmoid
        Z = ZR[:, :f_out]
        R = ZR[:, f_out:]

        # Candidate state.
        HRb = (H * R).astype(bf)
        SHR = jnp.dot(S, HRb, preferred_element_type=jnp.float32)
        H_tilde = jnp.tanh(
            g[:, 2 * f_out:]
            + jnp.dot(jnp.concatenate([HRb, SHR.astype(bf)], axis=1), W_hh,
                      preferred_element_type=jnp.float32)
        )

        # New hidden state (f32 carry).
        H_new = Z * H + (1.0 - Z) * H_tilde

        # ReLU + Linear(filters, 4); pack [H_new | y_pad] into one 128-lane row.
        y = jnp.dot(jnp.maximum(H_new, 0.0).astype(bf), W_l,
                    preferred_element_type=jnp.float32) + b_l          # (N, 128-F_out)
        out_ref[t] = jnp.concatenate([H_new, y], axis=1)               # (N, 128), lane-dense
        return H_new

    jax.lax.fori_loop(0, n_steps, step, h0_ref[...], unroll=True)


# ------------------------------- wrapper -------------------------------

def recurrent_gcn_pallas(S, X_seq, H0, packed):
    """Runs all T recurrent RecurrentGCN steps fully inside one Pallas kernel call.

    Returns (y_seq (T,N,4), h_seq (T,N,F_out)).
    """
    T, N, F_in = X_seq.shape
    F_out = H0.shape[1]
    W_big, b_big, W_hh, Wl_pad, bl_pad = packed

    vmem = pl.BlockSpec(memory_space=pltpu.MemorySpace.VMEM)   # everything resident, no pipelining

    slab = pl.pallas_call(
        _rgcn_seq_kernel,
        out_shape=jax.ShapeDtypeStruct((T, N, 128), jnp.float32),
        in_specs=[vmem] * 8,
        out_specs=vmem,
    )(
        S.astype(jnp.bfloat16),
        X_seq.astype(jnp.bfloat16),
        H0.astype(jnp.float32),
        W_big, b_big, W_hh, Wl_pad, bl_pad,
    )

    # TODO(synk): for large N (S no longer VMEM-resident: ~2N^2 bytes bf16), tile S
    # into row blocks and, on v7x, split node rows across the two TensorCores.
    h_seq = slab[:, :, :F_out]
    y_seq = slab[:, :, F_out:F_out + 4]
    return y_seq, h_seq


# ------------------------------- JAX glue -------------------------------

def scaled_laplacian_dense(edge_index, edge_weight, num_nodes):
    """Dense S = (2/lambda_max) * (I - D^{-1/2} A D^{-1/2}) - I, lambda_max=2 ("sym").

    NOTE: degree is taken from row sums, which matches PyG ChebConv only for
    symmetric edge lists (true for the bidirectional ring below).
    """
    row, col = edge_index[0], edge_index[1]
    A = jnp.zeros((num_nodes, num_nodes), jnp.float32).at[row, col].add(edge_weight)
    deg = jnp.sum(A, axis=1)
    dis = jnp.where(deg > 0, 1.0 / jnp.sqrt(deg), 0.0)
    return -(dis[:, None] * A * dis[None, :])


def init_params(key, f_in, f_out):
    """Deterministic synthetic parameters (6 ChebConvs with K=2 + Linear(f_out, 4))."""
    ks = jax.random.split(key, 20)
    idx = iter(range(20))

    def w(shape):
        return (0.1 * jax.random.normal(ks[next(idx)], shape)).astype(jnp.float32)

    params = []
    # order: xz, hz, xr, hr, xh, hh  -- each (W0, W1, b)
    for in_dim in (f_in, f_out, f_in, f_out, f_in, f_out):
        params += [w((in_dim, f_out)), w((in_dim, f_out)), w((1, f_out))]
    params += [w((f_out, 4)), w((1, 4))]     # final Linear(filters, 4)
    return tuple(params)


def pack_params(params, f_out):
    """Pack the 20 raw tensors into 5 slabs (weights -> bf16, biases f32).

    W_big row blocks follow the in-kernel concat order [X | SH | SX | H] and its
    column blocks are [Z | R | H~x-part]; all gate biases are pre-summed.
    """
    (wxz0, wxz1, bxz, whz0, whz1, bhz,
     wxr0, wxr1, bxr, whr0, whr1, bhr,
     wxh0, wxh1, bxh, whh0, whh1, bhh,
     wl, bl) = params
    bf = jnp.bfloat16
    zeros_h = jnp.zeros((f_out, f_out), jnp.float32)

    row_x = jnp.concatenate([wxz0, wxr0, wxh0], axis=1)       # (F_in,  3F_out)
    row_sh = jnp.concatenate([whz1, whr1, zeros_h], axis=1)   # (F_out, 3F_out)
    row_sx = jnp.concatenate([wxz1, wxr1, wxh1], axis=1)      # (F_in,  3F_out)
    row_h = jnp.concatenate([whz0, whr0, zeros_h], axis=1)    # (F_out, 3F_out)
    W_big = jnp.concatenate([row_x, row_sh, row_sx, row_h], axis=0).astype(bf)

    b_big = jnp.concatenate([bxz + bhz, bxr + bhr, bxh + bhh], axis=1)   # (1, 3F_out) f32

    W_hh = jnp.concatenate([whh0, whh1], axis=0).astype(bf)              # (2F_out, F_out)

    pad = 128 - f_out
    # Invariant: columns [4:] of Wl_pad / bl_pad must stay exactly zero (lane padding).
    Wl_pad = jnp.zeros((f_out, pad), jnp.float32).at[:, :4].set(wl).astype(bf)
    bl_pad = jnp.zeros((1, pad), jnp.float32).at[:, :4].set(bl)

    return W_big, b_big, W_hh, Wl_pad, bl_pad


def reference_forward_seq(S, X_seq, H0, params):
    """Pure-JAX f32 reference: T sequential RecurrentGCN steps."""
    (wxz0, wxz1, bxz, whz0, whz1, bhz,
     wxr0, wxr1, bxr, whr0, whr1, bhr,
     wxh0, wxh1, bxh, whh0, whh1, bhh,
     wl, bl) = params

    def cheb(t, w0, w1, b):
        return t @ w0 + (S @ t) @ w1 + b

    ys, hs = [], []
    H = H0
    for t in range(X_seq.shape[0]):
        X = X_seq[t]
        Z = jax.nn.sigmoid(cheb(X, wxz0, wxz1, bxz) + cheb(H, whz0, whz1, bhz))
        R = jax.nn.sigmoid(cheb(X, wxr0, wxr1, bxr) + cheb(H, whr0, whr1, bhr))
        HR = H * R
        H_tilde = jnp.tanh(cheb(X, wxh0, wxh1, bxh) + cheb(HR, whh0, whh1, bhh))
        H = Z * H + (1.0 - Z) * H_tilde
        ys.append(jnp.maximum(H, 0.0) @ wl + bl)
        hs.append(H)
    return jnp.stack(ys, 0), jnp.stack(hs, 0)


# ------------------------------- main -------------------------------

if __name__ == "__main__":
    N = 16            # nodes
    F_IN = 4          # node_features
    F_OUT = 32        # filters
    T = 8             # timesteps (recurrence fused into the kernel)

    key = jax.random.PRNGKey(0)
    k_x, k_w, k_e = jax.random.split(key, 3)

    # node feature sequence; H=None in the PyTorch forward -> zeros
    X_seq = jax.random.normal(k_x, (T, N, F_IN), dtype=jnp.float32)
    H0 = jnp.zeros((N, F_OUT), dtype=jnp.float32)

    # simple bidirectional ring graph
    src = jnp.arange(N, dtype=jnp.int32)
    dst = (src + 1) % N
    edge_index = jnp.stack([jnp.concatenate([src, dst]),
                            jnp.concatenate([dst, src])], axis=0)
    edge_weight = 0.5 + jax.random.uniform(k_e, (2 * N,), dtype=jnp.float32)

    # dense scaled Chebyshev Laplacian (sparse->dense conversion done in JAX glue)
    S = scaled_laplacian_dense(edge_index, edge_weight, N)

    params = init_params(k_w, F_IN, F_OUT)
    packed = pack_params(params, F_OUT)

    y, h = recurrent_gcn_pallas(S, X_seq, H0, packed)
    jax.block_until_ready((y, h))

    y_ref, h_ref = reference_forward_seq(S, X_seq, H0, params)
    assert y.shape == (T, N, 4) and h.shape == (T, N, F_OUT)
    # bf16 MXU operands (f32 accumulation / f32 carried state) vs f32 reference.
    assert jnp.allclose(y, y_ref, atol=5e-2, rtol=5e-2), float(jnp.max(jnp.abs(y - y_ref)))
    assert jnp.allclose(h, h_ref, atol=5e-2, rtol=5e-2), float(jnp.max(jnp.abs(h - h_ref)))

    print("KERNEL_OK")
</pallas_src>

<mosaic_0001>
module attributes {stable_mosaic.version = 11 : i64} {
  func.func @_rgcn_seq_kernel(%arg0: memref<16x16xbf16, #tpu.memory_space<vmem>>, %arg1: memref<8x16x4xbf16, #tpu.memory_space<vmem>>, %arg2: memref<16x32xf32, #tpu.memory_space<vmem>>, %arg3: memref<72x96xbf16, #tpu.memory_space<vmem>>, %arg4: memref<1x96xf32, #tpu.memory_space<vmem>>, %arg5: memref<64x32xbf16, #tpu.memory_space<vmem>>, %arg6: memref<32x96xbf16, #tpu.memory_space<vmem>>, %arg7: memref<1x96xf32, #tpu.memory_space<vmem>>, %arg8: memref<8x16x128xf32, #tpu.memory_space<vmem>>) attributes {dimension_semantics = [], scalar_prefetch = 0 : i64, scratch_operands = 0 : i64, tpu.core_type = #tpu.core_type<tc>} {
    %c0 = arith.constant 0 : index
    %c0_0 = arith.constant 0 : index
    %0 = vector.load %arg0[%c0, %c0_0] : memref<16x16xbf16, #tpu.memory_space<vmem>>, vector<16x16xbf16>
    %c0_1 = arith.constant 0 : index
    %c0_2 = arith.constant 0 : index
    %1 = vector.load %arg3[%c0_1, %c0_2] : memref<72x96xbf16, #tpu.memory_space<vmem>>, vector<72x96xbf16>
    %c0_3 = arith.constant 0 : index
    %c0_4 = arith.constant 0 : index
    %2 = vector.load %arg5[%c0_3, %c0_4] : memref<64x32xbf16, #tpu.memory_space<vmem>>, vector<64x32xbf16>
    %c0_5 = arith.constant 0 : index
    %c0_6 = arith.constant 0 : index
    %3 = vector.load %arg6[%c0_5, %c0_6] : memref<32x96xbf16, #tpu.memory_space<vmem>>, vector<32x96xbf16>
    %c0_7 = arith.constant 0 : index
    %c0_8 = arith.constant 0 : index
    %4 = vector.load %arg4[%c0_7, %c0_8] : memref<1x96xf32, #tpu.memory_space<vmem>>, vector<1x96xf32>
    %5 = vector.shape_cast %4 : vector<1x96xf32> to vector<1x96xf32>
    %6 = vector.broadcast %5 : vector<1x96xf32> to vector<16x96xf32>
    %c0_9 = arith.constant 0 : index
    %c0_10 = arith.constant 0 : index
    %7 = vector.load %arg7[%c0_9, %c0_10] : memref<1x96xf32, #tpu.memory_space<vmem>>, vector<1x96xf32>
    %8 = vector.shape_cast %7 : vector<1x96xf32> to vector<1x96xf32>
    %9 = vector.broadcast %8 : vector<1x96xf32> to vector<16x96xf32>
    %c0_11 = arith.constant 0 : index
    %c0_12 = arith.constant 0 : index
    %10 = vector.load %arg2[%c0_11, %c0_12] : memref<16x32xf32, #tpu.memory_space<vmem>>, vector<16x32xf32>
    %c0_i32 = arith.constant 0 : i32
    %11 = arith.truncf %10 : vector<16x32xf32> to vector<16x32xbf16>
    %12 = arith.index_cast %c0_i32 : i32 to index
    %c0_13 = arith.constant 0 : index
    %c0_14 = arith.constant 0 : index
    %13 = vector.load %arg1[%12, %c0_13, %c0_14] : memref<8x16x4xbf16, #tpu.memory_space<vmem>>, vector<1x16x4xbf16>
    %14 = vector.shape_cast %13 : vector<1x16x4xbf16> to vector<16x4xbf16>
    %15 = tpu.concatenate %11, %14 in 1 : vector<16x32xbf16>, vector<16x4xbf16> -> vector<16x36xbf16>
    %cst = arith.constant dense<0.000000e+00> : vector<16x36xf32>
    %16 = tpu.matmul %0, %15, %cst {dimension_numbers = #tpu.dot_dimension_numbers<[1], [0], [0], [1], [0, 0, 1, 1], [], []>} : vector<16x16xbf16>, vector<16x36xbf16>, vector<16x36xf32> -> vector<16x36xf32>
    %17 = arith.truncf %16 : vector<16x36xf32> to vector<16x36xbf16>
    %18 = tpu.concatenate %14, %17, %11 in 1 : vector<16x4xbf16>, vector<16x36xbf16>, vector<16x32xbf16> -> vector<16x72xbf16>
    %cst_15 = arith.constant dense<0.000000e+00> : vector<16x96xf32>
    %19 = tpu.matmul %18, %1, %cst_15 {dimension_numbers = #tpu.dot_dimension_numbers<[1], [0], [0], [1], [0, 0, 1, 1], [], []>} : vector<16x72xbf16>, vector<72x96xbf16>, vector<16x96xf32> -> vector<16x96xf32>
    %20 = arith.addf %19, %6 : vector<16x96xf32>
    %21 = vector.extract_strided_slice %20 {offsets = [0, 0], sizes = [16, 64], strides = [1, 1]} : vector<16x96xf32> to vector<16x64xf32>
    %22 = arith.negf %21 : vector<16x64xf32>
    %23 = math.exp %22 : vector<16x64xf32>
    %cst_16 = arith.constant 1.000000e+00 : f32
    %24 = vector.broadcast %cst_16 : f32 to vector<16x64xf32>
    %25 = arith.addf %24, %23 : vector<16x64xf32>
    %26 = arith.divf %24, %25 : vector<16x64xf32>
    %27 = vector.extract_strided_slice %26 {offsets = [0, 0], sizes = [16, 32], strides = [1, 1]} : vector<16x64xf32> to vector<16x32xf32>
    %28 = vector.extract_strided_slice %26 {offsets = [0, 32], sizes = [16, 32], strides = [1, 1]} : vector<16x64xf32> to vector<16x32xf32>
    %29 = arith.mulf %10, %28 : vector<16x32xf32>
    %30 = arith.truncf %29 : vector<16x32xf32> to vector<16x32xbf16>
    %cst_17 = arith.constant dense<0.000000e+00> : vector<16x32xf32>
    %31 = tpu.matmul %0, %30, %cst_17 {dimension_numbers = #tpu.dot_dimension_numbers<[1], [0], [0], [1], [0, 0, 1, 1], [], []>} : vector<16x16xbf16>, vector<16x32xbf16>, vector<16x32xf32> -> vector<16x32xf32>
    %32 = vector.extract_strided_slice %20 {offsets = [0, 64], sizes = [16, 32], strides = [1, 1]} : vector<16x96xf32> to vector<16x32xf32>
    %33 = arith.truncf %31 : vector<16x32xf32> to vector<16x32xbf16>
    %34 = tpu.concatenate %30, %33 in 1 : vector<16x32xbf16>, vector<16x32xbf16> -> vector<16x64xbf16>
    %cst_18 = arith.constant dense<0.000000e+00> : vector<16x32xf32>
    %35 = tpu.matmul %34, %2, %cst_18 {dimension_numbers = #tpu.dot_dimension_numbers<[1], [0], [0], [1], [0, 0, 1, 1], [], []>} : vector<16x64xbf16>, vector<64x32xbf16>, vector<16x32xf32> -> vector<16x32xf32>
    %36 = arith.addf %32, %35 : vector<16x32xf32>
    %37 = math.tanh %36 : vector<16x32xf32>
    %38 = arith.mulf %27, %10 : vector<16x32xf32>
    %cst_19 = arith.constant 1.000000e+00 : f32
    %39 = vector.broadcast %cst_19 : f32 to vector<16x32xf32>
    %40 = arith.subf %39, %27 : vector<16x32xf32>
    %41 = arith.mulf %40, %37 : vector<16x32xf32>
    %42 = arith.addf %38, %41 : vector<16x32xf32>
    %cst_20 = arith.constant 0.000000e+00 : f32
    %43 = vector.broadcast %cst_20 : f32 to vector<16x32xf32>
    %44 = arith.maximumf %42, %43 : vector<16x32xf32>
    %45 = arith.truncf %44 : vector<16x32xf32> to vector<16x32xbf16>
    %cst_21 = arith.constant dense<0.000000e+00> : vector<16x96xf32>
    %46 = tpu.matmul %45, %3, %cst_21 {dimension_numbers = #tpu.dot_dimension_numbers<[1], [0], [0], [1], [0, 0, 1, 1], [], []>} : vector<16x32xbf16>, vector<32x96xbf16>, vector<16x96xf32> -> vector<16x96xf32>
    %47 = arith.addf %46, %9 : vector<16x96xf32>
    %48 = tpu.concatenate %42, %47 in 1 : vector<16x32xf32>, vector<16x96xf32> -> vector<16x128xf32>
    %49 = arith.index_cast %c0_i32 : i32 to index
    %c0_22 = arith.constant 0 : index
    %c0_23 = arith.constant 0 : index
    %50 = vector.load %arg8[%49, %c0_22, %c0_23] : memref<8x16x128xf32, #tpu.memory_space<vmem>>, vector<1x16x128xf32>
    %51 = vector.shape_cast %50 : vector<1x16x128xf32> to vector<16x128xf32>
    %52 = vector.shape_cast %48 : vector<16x128xf32> to vector<1x16x128xf32>
    tpu.vector_store %arg8[%49, %c0_22, %c0_23], %52 {strides = array<i32>} : memref<8x16x128xf32, #tpu.memory_space<vmem>>, vector<1x16x128xf32>,
    %c1_i32 = arith.constant 1 : i32
    %53 = arith.truncf %42 : vector<16x32xf32> to vector<16x32xbf16>
    %54 = arith.index_cast %c1_i32 : i32 to index
    %c0_24 = arith.constant 0 : index
    %c0_25 = arith.constant 0 : index
    %55 = vector.load %arg1[%54, %c0_24, %c0_25] : memref<8x16x4xbf16, #tpu.memory_space<vmem>>, vector<1x16x4xbf16>
    %56 = vector.shape_cast %55 : vector<1x16x4xbf16> to vector<16x4xbf16>
    %57 = tpu.concatenate %53, %56 in 1 : vector<16x32xbf16>, vector<16x4xbf16> -> vector<16x36xbf16>
    %cst_26 = arith.constant dense<0.000000e+00> : vector<16x36xf32>
    %58 = tpu.matmul %0, %57, %cst_26 {dimension_numbers = #tpu.dot_dimension_numbers<[1], [0], [0], [1], [0, 0, 1, 1], [], []>} : vector<16x16xbf16>, vector<16x36xbf16>, vector<16x36xf32> -> vector<16x36xf32>
    %59 = arith.truncf %58 : vector<16x36xf32> to vector<16x36xbf16>
    %60 = tpu.concatenate %56, %59, %53 in 1 : vector<16x4xbf16>, vector<16x36xbf16>, vector<16x32xbf16> -> vector<16x72xbf16>
    %cst_27 = arith.constant dense<0.000000e+00> : vector<16x96xf32>
    %61 = tpu.matmul %60, %1, %cst_27 {dimension_numbers = #tpu.dot_dimension_numbers<[1], [0], [0], [1], [0, 0, 1, 1], [], []>} : vector<16x72xbf16>, vector<72x96xbf16>, vector<16x96xf32> -> vector<16x96xf32>
    %62 = arith.addf %61, %6 : vector<16x96xf32>
    %63 = vector.extract_strided_slice %62 {offsets = [0, 0], sizes = [16, 64], strides = [1, 1]} : vector<16x96xf32> to vector<16x64xf32>
    %64 = arith.negf %63 : vector<16x64xf32>
    %65 = math.exp %64 : vector<16x64xf32>
    %cst_28 = arith.constant 1.000000e+00 : f32
    %66 = vector.broadcast %cst_28 : f32 to vector<16x64xf32>
    %67 = arith.addf %66, %65 : vector<16x64xf32>
    %68 = arith.divf %66, %67 : vector<16x64xf32>
    %69 = vector.extract_strided_slice %68 {offsets = [0, 0], sizes = [16, 32], strides = [1, 1]} : vector<16x64xf32> to vector<16x32xf32>
    %70 = vector.extract_strided_slice %68 {offsets = [0, 32], sizes = [16, 32], strides = [1, 1]} : vector<16x64xf32> to vector<16x32xf32>
    %71 = arith.mulf %42, %70 : vector<16x32xf32>
    %72 = arith.truncf %71 : vector<16x32xf32> to vector<16x32xbf16>
    %cst_29 = arith.constant dense<0.000000e+00> : vector<16x32xf32>
    %73 = tpu.matmul %0, %72, %cst_29 {dimension_numbers = #tpu.dot_dimension_numbers<[1], [0], [0], [1], [0, 0, 1, 1], [], []>} : vector<16x16xbf16>, vector<16x32xbf16>, vector<16x32xf32> -> vector<16x32xf32>
    %74 = vector.extract_strided_slice %62 {offsets = [0, 64], sizes = [16, 32], strides = [1, 1]} : vector<16x96xf32> to vector<16x32xf32>
    %75 = arith.truncf %73 : vector<16x32xf32> to vector<16x32xbf16>
    %76 = tpu.concatenate %72, %75 in 1 : vector<16x32xbf16>, vector<16x32xbf16> -> vector<16x64xbf16>
    %cst_30 = arith.constant dense<0.000000e+00> : vector<16x32xf32>
    %77 = tpu.matmul %76, %2, %cst_30 {dimension_numbers = #tpu.dot_dimension_numbers<[1], [0], [0], [1], [0, 0, 1, 1], [], []>} : vector<16x64xbf16>, vector<64x32xbf16>, vector<16x32xf32> -> vector<16x32xf32>
    %78 = arith.addf %74, %77 : vector<16x32xf32>
    %79 = math.tanh %78 : vector<16x32xf32>
    %80 = arith.mulf %69, %42 : vector<16x32xf32>
    %cst_31 = arith.constant 1.000000e+00 : f32
    %81 = vector.broadcast %cst_31 : f32 to vector<16x32xf32>
    %82 = arith.subf %81, %69 : vector<16x32xf32>
    %83 = arith.mulf %82, %79 : vector<16x32xf32>
    %84 = arith.addf %80, %83 : vector<16x32xf32>
    %cst_32 = arith.constant 0.000000e+00 : f32
    %85 = vector.broadcast %cst_32 : f32 to vector<16x32xf32>
    %86 = arith.maximumf %84, %85 : vector<16x32xf32>
    %87 = arith.truncf %86 : vector<16x32xf32> to vector<16x32xbf16>
    %cst_33 = arith.constant dense<0.000000e+00> : vector<16x96xf32>
    %88 = tpu.matmul %87, %3, %cst_33 {dimension_numbers = #tpu.dot_dimension_numbers<[1], [0], [0], [1], [0, 0, 1, 1], [], []>} : vector<16x32xbf16>, vector<32x96xbf16>, vector<16x96xf32> -> vector<16x96xf32>
    %89 = arith.addf %88, %9 : vector<16x96xf32>
    %90 = tpu.concatenate %84, %89 in 1 : vector<16x32xf32>, vector<16x96xf32> -> vector<16x128xf32>
    %91 = arith.index_cast %c1_i32 : i32 to index
    %c0_34 = arith.constant 0 : index
    %c0_35 = arith.constant 0 : index
    %92 = vector.load %arg8[%91, %c0_34, %c0_35] : memref<8x16x128xf32, #tpu.memory_space<vmem>>, vector<1x16x128xf32>
    %93 = vector.shape_cast %92 : vector<1x16x128xf32> to vector<16x128xf32>
    %94 = vector.shape_cast %90 : vector<16x128xf32> to vector<1x16x128xf32>
    tpu.vector_store %arg8[%91, %c0_34, %c0_35], %94 {strides = array<i32>} : memref<8x16x128xf32, #tpu.memory_space<vmem>>, vector<1x16x128xf32>,
    %c2_i32 = arith.constant 2 : i32
    %95 = arith.truncf %84 : vector<16x32xf32> to vector<16x32xbf16>
    %96 = arith.index_cast %c2_i32 : i32 to index
    %c0_36 = arith.constant 0 : index
    %c0_37 = arith.constant 0 : index
    %97 = vector.load %arg1[%96, %c0_36, %c0_37] : memref<8x16x4xbf16, #tpu.memory_space<vmem>>, vector<1x16x4xbf16>
    %98 = vector.shape_cast %97 : vector<1x16x4xbf16> to vector<16x4xbf16>
    %99 = tpu.concatenate %95, %98 in 1 : vector<16x32xbf16>, vector<16x4xbf16> -> vector<16x36xbf16>
    %cst_38 = arith.constant dense<0.000000e+00> : vector<16x36xf32>
    %100 = tpu.matmul %0, %99, %cst_38 {dimension_numbers = #tpu.dot_dimension_numbers<[1], [0], [0], [1], [0, 0, 1, 1], [], []>} : vector<16x16xbf16>, vector<16x36xbf16>, vector<16x36xf32> -> vector<16x36xf32>
    %101 = arith.truncf %100 : vector<16x36xf32> to vector<16x36xbf16>
    %102 = tpu.concatenate %98, %101, %95 in 1 : vector<16x4xbf16>, vector<16x36xbf16>, vector<16x32xbf16> -> vector<16x72xbf16>
    %cst_39 = arith.constant dense<0.000000e+00> : vector<16x96xf32>
    %103 = tpu.matmul %102, %1, %cst_39 {dimension_numbers = #tpu.dot_dimension_numbers<[1], [0], [0], [1], [0, 0, 1, 1], [], []>} : vector<16x72xbf16>, vector<72x96xbf16>, vector<16x96xf32> -> vector<16x96xf32>
    %104 = arith.addf %103, %6 : vector<16x96xf32>
    %105 = vector.extract_strided_slice %104 {offsets = [0, 0], sizes = [16, 64], strides = [1, 1]} : vector<16x96xf32> to vector<16x64xf32>
    %106 = arith.negf %105 : vector<16x64xf32>
    %107 = math.exp %106 : vector<16x64xf32>
    %cst_40 = arith.constant 1.000000e+00 : f32
    %108 = vector.broadcast %cst_40 : f32 to vector<16x64xf32>
    %109 = arith.addf %108, %107 : vector<16x64xf32>
    %110 = arith.divf %108, %109 : vector<16x64xf32>
    %111 = vector.extract_strided_slice %110 {offsets = [0, 0], sizes = [16, 32], strides = [1, 1]} : vector<16x64xf32> to vector<16x32xf32>
    %112 = vector.extract_strided_slice %110 {offsets = [0, 32], sizes = [16, 32], strides = [1, 1]} : vector<16x64xf32> to vector<16x32xf32>
    %113 = arith.mulf %84, %112 : vector<16x32xf32>
    %114 = arith.truncf %113 : vector<16x32xf32> to vector<16x32xbf16>
    %cst_41 = arith.constant dense<0.000000e+00> : vector<16x32xf32>
    %115 = tpu.matmul %0, %114, %cst_41 {dimension_numbers = #tpu.dot_dimension_numbers<[1], [0], [0], [1], [0, 0, 1, 1], [], []>} : vector<16x16xbf16>, vector<16x32xbf16>, vector<16x32xf32> -> vector<16x32xf32>
    %116 = vector.extract_strided_slice %104 {offsets = [0, 64], sizes = [16, 32], strides = [1, 1]} : vector<16x96xf32> to vector<16x32xf32>
    %117 = arith.truncf %115 : vector<16x32xf32> to vector<16x32xbf16>
    %118 = tpu.concatenate %114, %117 in 1 : vector<16x32xbf16>, vector<16x32xbf16> -> vector<16x64xbf16>
    %cst_42 = arith.constant dense<0.000000e+00> : vector<16x32xf32>
    %119 = tpu.matmul %118, %2, %cst_42 {dimension_numbers = #tpu.dot_dimension_numbers<[1], [0], [0], [1], [0, 0, 1, 1], [], []>} : vector<16x64xbf16>, vector<64x32xbf16>, vector<16x32xf32> -> vector<16x32xf32>
    %120 = arith.addf %116, %119 : vector<16x32xf32>
    %121 = math.tanh %120 : vector<16x32xf32>
    %122 = arith.mulf %111, %84 : vector<16x32xf32>
    %cst_43 = arith.constant 1.000000e+00 : f32
    %123 = vector.broadcast %cst_43 : f32 to vector<16x32xf32>
    %124 = arith.subf %123, %111 : vector<16x32xf32>
    %125 = arith.mulf %124, %121 : vector<16x32xf32>
    %126 = arith.addf %122, %125 : vector<16x32xf32>
    %cst_44 = arith.constant 0.000000e+00 : f32
    %127 = vector.broadcast %cst_44 : f32 to vector<16x32xf32>
    %128 = arith.maximumf %126, %127 : vector<16x32xf32>
    %129 = arith.truncf %128 : vector<16x32xf32> to vector<16x32xbf16>
    %cst_45 = arith.constant dense<0.000000e+00> : vector<16x96xf32>
    %130 = tpu.matmul %129, %3, %cst_45 {dimension_numbers = #tpu.dot_dimension_numbers<[1], [0], [0], [1], [0, 0, 1, 1], [], []>} : vector<16x32xbf16>, vector<32x96xbf16>, vector<16x96xf32> -> vector<16x96xf32>
    %131 = arith.addf %130, %9 : vector<16x96xf32>
    %132 = tpu.concatenate %126, %131 in 1 : vector<16x32xf32>, vector<16x96xf32> -> vector<16x128xf32>
    %133 = arith.index_cast %c2_i32 : i32 to index
    %c0_46 = arith.constant 0 : index
    %c0_47 = arith.constant 0 : index
    %134 = vector.load %arg8[%133, %c0_46, %c0_47] : memref<8x16x128xf32, #tpu.memory_space<vmem>>, vector<1x16x128xf32>
    %135 = vector.shape_cast %134 : vector<1x16x128xf32> to vector<16x128xf32>
    %136 = vector.shape_cast %132 : vector<16x128xf32> to vector<1x16x128xf32>
    tpu.vector_store %arg8[%133, %c0_46, %c0_47], %136 {strides = array<i32>} : memref<8x16x128xf32, #tpu.memory_space<vmem>>, vector<1x16x128xf32>,
    %c3_i32 = arith.constant 3 : i32
    %137 = arith.truncf %126 : vector<16x32xf32> to vector<16x32xbf16>
    %138 = arith.index_cast %c3_i32 : i32 to index
    %c0_48 = arith.constant 0 : index
    %c0_49 = arith.constant 0 : index
    %139 = vector.load %arg1[%138, %c0_48, %c0_49] : memref<8x16x4xbf16, #tpu.memory_space<vmem>>, vector<1x16x4xbf16>
    %140 = vector.shape_cast %139 : vector<1x16x4xbf16> to vector<16x4xbf16>
    %141 = tpu.concatenate %137, %140 in 1 : vector<16x32xbf16>, vector<16x4xbf16> -> vector<16x36xbf16>
    %cst_50 = arith.constant dense<0.000000e+00> : vector<16x36xf32>
    %142 = tpu.matmul %0, %141, %cst_50 {dimension_numbers = #tpu.dot_dimension_numbers<[1], [0], [0], [1], [0, 0, 1, 1], [], []>} : vector<16x16xbf16>, vector<16x36xbf16>, vector<16x36xf32> -> vector<16x36xf32>
    %143 = arith.truncf %142 : vector<16x36xf32> to vector<16x36xbf16>
    %144 = tpu.concatenate %140, %143, %137 in 1 : vector<16x4xbf16>, vector<16x36xbf16>, vector<16x32xbf16> -> vector<16x72xbf16>
    %cst_51 = arith.constant dense<0.000000e+00> : vector<16x96xf32>
    %145 = tpu.matmul %144, %1, %cst_51 {dimension_numbers = #tpu.dot_dimension_numbers<[1], [0], [0], [1], [0, 0, 1, 1], [], []>} : vector<16x72xbf16>, vector<72x96xbf16>, vector<16x96xf32> -> vector<16x96xf32>
    %146 = arith.addf %145, %6 : vector<16x96xf32>
    %147 = vector.extract_strided_slice %146 {offsets = [0, 0], sizes = [16, 64], strides = [1, 1]} : vector<16x96xf32> to vector<16x64xf32>
    %148 = arith.negf %147 : vector<16x64xf32>
    %149 = math.exp %148 : vector<16x64xf32>
    %cst_52 = arith.constant 1.000000e+00 : f32
    %150 = vector.broadcast %cst_52 : f32 to vector<16x64xf32>
    %151 = arith.addf %150, %149 : vector<16x64xf32>
    %152 = arith.divf %150, %151 : vector<16x64xf32>
    %153 = vector.extract_strided_slice %152 {offsets = [0, 0], sizes = [16, 32], strides = [1, 1]} : vector<16x64xf32> to vector<16x32xf32>
    %154 = vector.extract_strided_slice %152 {offsets = [0, 32], sizes = [16, 32], strides = [1, 1]} : vector<16x64xf32> to vector<16x32xf32>
    %155 = arith.mulf %126, %154 : vector<16x32xf32>
    %156 = arith.truncf %155 : vector<16x32xf32> to vector<16x32xbf16>
    %cst_53 = arith.constant dense<0.000000e+00> : vector<16x32xf32>
    %157 = tpu.matmul %0, %156, %cst_53 {dimension_numbers = #tpu.dot_dimension_numbers<[1], [0], [0], [1], [0, 0, 1, 1], [], []>} : vector<16x16xbf16>, vector<16x32xbf16>, vector<16x32xf32> -> vector<16x32xf32>
    %158 = vector.extract_strided_slice %146 {offsets = [0, 64], sizes = [16, 32], strides = [1, 1]} : vector<16x96xf32> to vector<16x32xf32>
    %159 = arith.truncf %157 : vector<16x32xf32> to vector<16x32xbf16>
    %160 = tpu.concatenate %156, %159 in 1 : vector<16x32xbf16>, vector<16x32xbf16> -> vector<16x64xbf16>
    %cst_54 = arith.constant dense<0.000000e+00> : vector<16x32xf32>
    %161 = tpu.matmul %160, %2, %cst_54 {dimension_numbers = #tpu.dot_dimension_numbers<[1], [0], [0], [1], [0, 0, 1, 1], [], []>} : vector<16x64xbf16>, vector<64x32xbf16>, vector<16x32xf32> -> vector<16x32xf32>
    %162 = arith.addf %158, %161 : vector<16x32xf32>
    %163 = math.tanh %162 : vector<16x32xf32>
    %164 = arith.mulf %153, %126 : vector<16x32xf32>
    %cst_55 = arith.constant 1.000000e+00 : f32
    %165 = vector.broadcast %cst_55 : f32 to vector<16x32xf32>
    %166 = arith.subf %165, %153 : vector<16x32xf32>
    %167 = arith.mulf %166, %163 : vector<16x32xf32>
    %168 = arith.addf %164, %167 : vector<16x32xf32>
    %cst_56 = arith.constant 0.000000e+00 : f32
    %169 = vector.broadcast %cst_56 : f32 to vector<16x32xf32>
    %170 = arith.maximumf %168, %169 : vector<16x32xf32>
    %171 = arith.truncf %170 : vector<16x32xf32> to vector<16x32xbf16>
    %cst_57 = arith.constant dense<0.000000e+00> : vector<16x96xf32>
    %172 = tpu.matmul %171, %3, %cst_57 {dimension_numbers = #tpu.dot_dimension_numbers<[1], [0], [0], [1], [0, 0, 1, 1], [], []>} : vector<16x32xbf16>, vector<32x96xbf16>, vector<16x96xf32> -> vector<16x96xf32>
    %173 = arith.addf %172, %9 : vector<16x96xf32>
    %174 = tpu.concatenate %168, %173 in 1 : vector<16x32xf32>, vector<16x96xf32> -> vector<16x128xf32>
    %175 = arith.index_cast %c3_i32 : i32 to index
    %c0_58 = arith.constant 0 : index
    %c0_59 = arith.constant 0 : index
    %176 = vector.load %arg8[%175, %c0_58, %c0_59] : memref<8x16x128xf32, #tpu.memory_space<vmem>>, vector<1x16x128xf32>
    %177 = vector.shape_cast %176 : vector<1x16x128xf32> to vector<16x128xf32>
    %178 = vector.shape_cast %174 : vector<16x128xf32> to vector<1x16x128xf32>
    tpu.vector_store %arg8[%175, %c0_58, %c0_59], %178 {strides = array<i32>} : memref<8x16x128xf32, #tpu.memory_space<vmem>>, vector<1x16x128xf32>,
    %c4_i32 = arith.constant 4 : i32
    %179 = arith.truncf %168 : vector<16x32xf32> to vector<16x32xbf16>
    %180 = arith.index_cast %c4_i32 : i32 to index
    %c0_60 = arith.constant 0 : index
    %c0_61 = arith.constant 0 : index
    %181 = vector.load %arg1[%180, %c0_60, %c0_61] : memref<8x16x4xbf16, #tpu.memory_space<vmem>>, vector<1x16x4xbf16>
    %182 = vector.shape_cast %181 : vector<1x16x4xbf16> to vector<16x4xbf16>
    %183 = tpu.concatenate %179, %182 in 1 : vector<16x32xbf16>, vector<16x4xbf16> -> vector<16x36xbf16>
    %cst_62 = arith.constant dense<0.000000e+00> : vector<16x36xf32>
    %184 = tpu.matmul %0, %183, %cst_62 {dimension_numbers = #tpu.dot_dimension_numbers<[1], [0], [0], [1], [0, 0, 1, 1], [], []>} : vector<16x16xbf16>, vector<16x36xbf16>, vector<16x36xf32> -> vector<16x36xf32>
    %185 = arith.truncf %184 : vector<16x36xf32> to vector<16x36xbf16>
    %186 = tpu.concatenate %182, %185, %179 in 1 : vector<16x4xbf16>, vector<16x36xbf16>, vector<16x32xbf16> -> vector<16x72xbf16>
    %cst_63 = arith.constant dense<0.000000e+00> : vector<16x96xf32>
    %187 = tpu.matmul %186, %1, %cst_63 {dimension_numbers = #tpu.dot_dimension_numbers<[1], [0], [0], [1], [0, 0, 1, 1], [], []>} : vector<16x72xbf16>, vector<72x96xbf16>, vector<16x96xf32> -> vector<16x96xf32>
    %188 = arith.addf %187, %6 : vector<16x96xf32>
    %189 = vector.extract_strided_slice %188 {offsets = [0, 0], sizes = [16, 64], strides = [1, 1]} : vector<16x96xf32> to vector<16x64xf32>
    %190 = arith.negf %189 : vector<16x64xf32>
    %191 = math.exp %190 : vector<16x64xf32>
    %cst_64 = arith.constant 1.000000e+00 : f32
    %192 = vector.broadcast %cst_64 : f32 to vector<16x64xf32>
    %193 = arith.addf %192, %191 : vector<16x64xf32>
    %194 = arith.divf %192, %193 : vector<16x64xf32>
    %195 = vector.extract_strided_slice %194 {offsets = [0, 0], sizes = [16, 32], strides = [1, 1]} : vector<16x64xf32> to vector<16x32xf32>
    %196 = vector.extract_strided_slice %194 {offsets = [0, 32], sizes = [16, 32], strides = [1, 1]} : vector<16x64xf32> to vector<16x32xf32>
    %197 = arith.mulf %168, %196 : vector<16x32xf32>
    %198 = arith.truncf %197 : vector<16x32xf32> to vector<16x32xbf16>
    %cst_65 = arith.constant dense<0.000000e+00> : vector<16x32xf32>
    %199 = tpu.matmul %0, %198, %cst_65 {dimension_numbers = #tpu.dot_dimension_numbers<[1], [0], [0], [1], [0, 0, 1, 1], [], []>} : vector<16x16xbf16>, vector<16x32xbf16>, vector<16x32xf32> -> vector<16x32xf32>
    %200 = vector.extract_strided_slice %188 {offsets = [0, 64], sizes = [16, 32], strides = [1, 1]} : vector<16x96xf32> to vector<16x32xf32>
    %201 = arith.truncf %199 : vector<16x32xf32> to vector<16x32xbf16>
    %202 = tpu.concatenate %198, %201 in 1 : vector<16x32xbf16>, vector<16x32xbf16> -> vector<16x64xbf16>
    %cst_66 = arith.constant dense<0.000000e+00> : vector<16x32xf32>
    %203 = tpu.matmul %202, %2, %cst_66 {dimension_numbers = #tpu.dot_dimension_numbers<[1], [0], [0], [1], [0, 0, 1, 1], [], []>} : vector<16x64xbf16>, vector<64x32xbf16>, vector<16x32xf32> -> vector<16x32xf32>
    %204 = arith.addf %200, %203 : vector<16x32xf32>
    %205 = math.tanh %204 : vector<16x32xf32>
    %206 = arith.mulf %195, %168 : vector<16x32xf32>
    %cst_67 = arith.constant 1.000000e+00 : f32
    %207 = vector.broadcast %cst_67 : f32 to vector<16x32xf32>
    %208 = arith.subf %207, %195 : vector<16x32xf32>
    %209 = arith.mulf %208, %205 : vector<16x32xf32>
    %210 = arith.addf %206, %209 : vector<16x32xf32>
    %cst_68 = arith.constant 0.000000e+00 : f32
    %211 = vector.broadcast %cst_68 : f32 to vector<16x32xf32>
    %212 = arith.maximumf %210, %211 : vector<16x32xf32>
    %213 = arith.truncf %212 : vector<16x32xf32> to vector<16x32xbf16>
    %cst_69 = arith.constant dense<0.000000e+00> : vector<16x96xf32>
    %214 = tpu.matmul %213, %3, %cst_69 {dimension_numbers = #tpu.dot_dimension_numbers<[1], [0], [0], [1], [0, 0, 1, 1], [], []>} : vector<16x32xbf16>, vector<32x96xbf16>, vector<16x96xf32> -> vector<16x96xf32>
    %215 = arith.addf %214, %9 : vector<16x96xf32>
    %216 = tpu.concatenate %210, %215 in 1 : vector<16x32xf32>, vector<16x96xf32> -> vector<16x128xf32>
    %217 = arith.index_cast %c4_i32 : i32 to index
    %c0_70 = arith.constant 0 : index
    %c0_71 = arith.constant 0 : index
    %218 = vector.load %arg8[%217, %c0_70, %c0_71] : memref<8x16x128xf32, #tpu.memory_space<vmem>>, vector<1x16x128xf32>
    %219 = vector.shape_cast %218 : vector<1x16x128xf32> to vector<16x128xf32>
    %220 = vector.shape_cast %216 : vector<16x128xf32> to vector<1x16x128xf32>
    tpu.vector_store %arg8[%217, %c0_70, %c0_71], %220 {strides = array<i32>} : memref<8x16x128xf32, #tpu.memory_space<vmem>>, vector<1x16x128xf32>,
    %c5_i32 = arith.constant 5 : i32
    %221 = arith.truncf %210 : vector<16x32xf32> to vector<16x32xbf16>
    %222 = arith.index_cast %c5_i32 : i32 to index
    %c0_72 = arith.constant 0 : index
    %c0_73 = arith.constant 0 : index
    %223 = vector.load %arg1[%222, %c0_72, %c0_73] : memref<8x16x4xbf16, #tpu.memory_space<vmem>>, vector<1x16x4xbf16>
    %224 = vector.shape_cast %223 : vector<1x16x4xbf16> to vector<16x4xbf16>
    %225 = tpu.concatenate %221, %224 in 1 : vector<16x32xbf16>, vector<16x4xbf16> -> vector<16x36xbf16>
    %cst_74 = arith.constant dense<0.000000e+00> : vector<16x36xf32>
    %226 = tpu.matmul %0, %225, %cst_74 {dimension_numbers = #tpu.dot_dimension_numbers<[1], [0], [0], [1], [0, 0, 1, 1], [], []>} : vector<16x16xbf16>, vector<16x36xbf16>, vector<16x36xf32> -> vector<16x36xf32>
    %227 = arith.truncf %226 : vector<16x36xf32> to vector<16x36xbf16>
    %228 = tpu.concatenate %224, %227, %221 in 1 : vector<16x4xbf16>, vector<16x36xbf16>, vector<16x32xbf16> -> vector<16x72xbf16>
    %cst_75 = arith.constant dense<0.000000e+00> : vector<16x96xf32>
    %229 = tpu.matmul %228, %1, %cst_75 {dimension_numbers = #tpu.dot_dimension_numbers<[1], [0], [0], [1], [0, 0, 1, 1], [], []>} : vector<16x72xbf16>, vector<72x96xbf16>, vector<16x96xf32> -> vector<16x96xf32>
    %230 = arith.addf %229, %6 : vector<16x96xf32>
    %231 = vector.extract_strided_slice %230 {offsets = [0, 0], sizes = [16, 64], strides = [1, 1]} : vector<16x96xf32> to vector<16x64xf32>
    %232 = arith.negf %231 : vector<16x64xf32>
    %233 = math.exp %232 : vector<16x64xf32>
    %cst_76 = arith.constant 1.000000e+00 : f32
    %234 = vector.broadcast %cst_76 : f32 to vector<16x64xf32>
    %235 = arith.addf %234, %233 : vector<16x64xf32>
    %236 = arith.divf %234, %235 : vector<16x64xf32>
    %237 = vector.extract_strided_slice %236 {offsets = [0, 0], sizes = [16, 32], strides = [1, 1]} : vector<16x64xf32> to vector<16x32xf32>
    %238 = vector.extract_strided_slice %236 {offsets = [0, 32], sizes = [16, 32], strides = [1, 1]} : vector<16x64xf32> to vector<16x32xf32>
    %239 = arith.mulf %210, %238 : vector<16x32xf32>
    %240 = arith.truncf %239 : vector<16x32xf32> to vector<16x32xbf16>
    %cst_77 = arith.constant dense<0.000000e+00> : vector<16x32xf32>
    %241 = tpu.matmul %0, %240, %cst_77 {dimension_numbers = #tpu.dot_dimension_numbers<[1], [0], [0], [1], [0, 0, 1, 1], [], []>} : vector<16x16xbf16>, vector<16x32xbf16>, vector<16x32xf32> -> vector<16x32xf32>
    %242 = vector.extract_strided_slice %230 {offsets = [0, 64], sizes = [16, 32], strides = [1, 1]} : vector<16x96xf32> to vector<16x32xf32>
    %243 = arith.truncf %241 : vector<16x32xf32> to vector<16x32xbf16>
    %244 = tpu.concatenate %240, %243 in 1 : vector<16x32xbf16>, vector<16x32xbf16> -> vector<16x64xbf16>
    %cst_78 = arith.constant dense<0.000000e+00> : vector<16x32xf32>
    %245 = tpu.matmul %244, %2, %cst_78 {dimension_numbers = #tpu.dot_dimension_numbers<[1], [0], [0], [1], [0, 0, 1, 1], [], []>} : vector<16x64xbf16>, vector<64x32xbf16>, vector<16x32xf32> -> vector<16x32xf32>
    %246 = arith.addf %242, %245 : vector<16x32xf32>
    %247 = math.tanh %246 : vector<16x32xf32>
    %248 = arith.mulf %237, %210 : vector<16x32xf32>
    %cst_79 = arith.constant 1.000000e+00 : f32
    %249 = vector.broadcast %cst_79 : f32 to vector<16x32xf32>
    %250 = arith.subf %249, %237 : vector<16x32xf32>
    %251 = arith.mulf %250, %247 : vector<16x32xf32>
    %252 = arith.addf %248, %251 : vector<16x32xf32>
    %cst_80 = arith.constant 0.000000e+00 : f32
    %253 = vector.broadcast %cst_80 : f32 to vector<16x32xf32>
    %254 = arith.maximumf %252, %253 : vector<16x32xf32>
    %255 = arith.truncf %254 : vector<16x32xf32> to vector<16x32xbf16>
    %cst_81 = arith.constant dense<0.000000e+00> : vector<16x96xf32>
    %256 = tpu.matmul %255, %3, %cst_81 {dimension_numbers = #tpu.dot_dimension_numbers<[1], [0], [0], [1], [0, 0, 1, 1], [], []>} : vector<16x32xbf16>, vector<32x96xbf16>, vector<16x96xf32> -> vector<16x96xf32>
    %257 = arith.addf %256, %9 : vector<16x96xf32>
    %258 = tpu.concatenate %252, %257 in 1 : vector<16x32xf32>, vector<16x96xf32> -> vector<16x128xf32>
    %259 = arith.index_cast %c5_i32 : i32 to index
    %c0_82 = arith.constant 0 : index
    %c0_83 = arith.constant 0 : index
    %260 = vector.load %arg8[%259, %c0_82, %c0_83] : memref<8x16x128xf32, #tpu.memory_space<vmem>>, vector<1x16x128xf32>
    %261 = vector.shape_cast %260 : vector<1x16x128xf32> to vector<16x128xf32>
    %262 = vector.shape_cast %258 : vector<16x128xf32> to vector<1x16x128xf32>
    tpu.vector_store %arg8[%259, %c0_82, %c0_83], %262 {strides = array<i32>} : memref<8x16x128xf32, #tpu.memory_space<vmem>>, vector<1x16x128xf32>,
    %c6_i32 = arith.constant 6 : i32
    %263 = arith.truncf %252 : vector<16x32xf32> to vector<16x32xbf16>
    %264 = arith.index_cast %c6_i32 : i32 to index
    %c0_84 = arith.constant 0 : index
    %c0_85 = arith.constant 0 : index
    %265 = vector.load %arg1[%264, %c0_84, %c0_85] : memref<8x16x4xbf16, #tpu.memory_space<vmem>>, vector<1x16x4xbf16>
    %266 = vector.shape_cast %265 : vector<1x16x4xbf16> to vector<16x4xbf16>
    %267 = tpu.concatenate %263, %266 in 1 : vector<16x32xbf16>, vector<16x4xbf16> -> vector<16x36xbf16>
    %cst_86 = arith.constant dense<0.000000e+00> : vector<16x36xf32>
    %268 = tpu.matmul %0, %267, %cst_86 {dimension_numbers = #tpu.dot_dimension_numbers<[1], [0], [0], [1], [0, 0, 1, 1], [], []>} : vector<16x16xbf16>, vector<16x36xbf16>, vector<16x36xf32> -> vector<16x36xf32>
    %269 = arith.truncf %268 : vector<16x36xf32> to vector<16x36xbf16>
    %270 = tpu.concatenate %266, %269, %263 in 1 : vector<16x4xbf16>, vector<16x36xbf16>, vector<16x32xbf16> -> vector<16x72xbf16>
    %cst_87 = arith.constant dense<0.000000e+00> : vector<16x96xf32>
    %271 = tpu.matmul %270, %1, %cst_87 {dimension_numbers = #tpu.dot_dimension_numbers<[1], [0], [0], [1], [0, 0, 1, 1], [], []>} : vector<16x72xbf16>, vector<72x96xbf16>, vector<16x96xf32> -> vector<16x96xf32>
    %272 = arith.addf %271, %6 : vector<16x96xf32>
    %273 = vector.extract_strided_slice %272 {offsets = [0, 0], sizes = [16, 64], strides = [1, 1]} : vector<16x96xf32> to vector<16x64xf32>
    %274 = arith.negf %273 : vector<16x64xf32>
    %275 = math.exp %274 : vector<16x64xf32>
    %cst_88 = arith.constant 1.000000e+00 : f32
    %276 = vector.broadcast %cst_88 : f32 to vector<16x64xf32>
    %277 = arith.addf %276, %275 : vector<16x64xf32>
    %278 = arith.divf %276, %277 : vector<16x64xf32>
    %279 = vector.extract_strided_slice %278 {offsets = [0, 0], sizes = [16, 32], strides = [1, 1]} : vector<16x64xf32> to vector<16x32xf32>
    %280 = vector.extract_strided_slice %278 {offsets = [0, 32], sizes = [16, 32], strides = [1, 1]} : vector<16x64xf32> to vector<16x32xf32>
    %281 = arith.mulf %252, %280 : vector<16x32xf32>
    %282 = arith.truncf %281 : vector<16x32xf32> to vector<16x32xbf16>
    %cst_89 = arith.constant dense<0.000000e+00> : vector<16x32xf32>
    %283 = tpu.matmul %0, %282, %cst_89 {dimension_numbers = #tpu.dot_dimension_numbers<[1], [0], [0], [1], [0, 0, 1, 1], [], []>} : vector<16x16xbf16>, vector<16x32xbf16>, vector<16x32xf32> -> vector<16x32xf32>
    %284 = vector.extract_strided_slice %272 {offsets = [0, 64], sizes = [16, 32], strides = [1, 1]} : vector<16x96xf32> to vector<16x32xf32>
    %285 = arith.truncf %283 : vector<16x32xf32> to vector<16x32xbf16>
    %286 = tpu.concatenate %282, %285 in 1 : vector<16x32xbf16>, vector<16x32xbf16> -> vector<16x64xbf16>
    %cst_90 = arith.constant dense<0.000000e+00> : vector<16x32xf32>
    %287 = tpu.matmul %286, %2, %cst_90 {dimension_numbers = #tpu.dot_dimension_numbers<[1], [0], [0], [1], [0, 0, 1, 1], [], []>} : vector<16x64xbf16>, vector<64x32xbf16>, vector<16x32xf32> -> vector<16x32xf32>
    %288 = arith.addf %284, %287 : vector<16x32xf32>
    %289 = math.tanh %288 : vector<16x32xf32>
    %290 = arith.mulf %279, %252 : vector<16x32xf32>
    %cst_91 = arith.constant 1.000000e+00 : f32
    %291 = vector.broadcast %cst_91 : f32 to vector<16x32xf32>
    %292 = arith.subf %291, %279 : vector<16x32xf32>
    %293 = arith.mulf %292, %289 : vector<16x32xf32>
    %294 = arith.addf %290, %293 : vector<16x32xf32>
    %cst_92 = arith.constant 0.000000e+00 : f32
    %295 = vector.broadcast %cst_92 : f32 to vector<16x32xf32>
    %296 = arith.maximumf %294, %295 : vector<16x32xf32>
    %297 = arith.truncf %296 : vector<16x32xf32> to vector<16x32xbf16>
    %cst_93 = arith.constant dense<0.000000e+00> : vector<16x96xf32>
    %298 = tpu.matmul %297, %3, %cst_93 {dimension_numbers = #tpu.dot_dimension_numbers<[1], [0], [0], [1], [0, 0, 1, 1], [], []>} : vector<16x32xbf16>, vector<32x96xbf16>, vector<16x96xf32> -> vector<16x96xf32>
    %299 = arith.addf %298, %9 : vector<16x96xf32>
    %300 = tpu.concatenate %294, %299 in 1 : vector<16x32xf32>, vector<16x96xf32> -> vector<16x128xf32>
    %301 = arith.index_cast %c6_i32 : i32 to index
    %c0_94 = arith.constant 0 : index
    %c0_95 = arith.constant 0 : index
    %302 = vector.load %arg8[%301, %c0_94, %c0_95] : memref<8x16x128xf32, #tpu.memory_space<vmem>>, vector<1x16x128xf32>
    %303 = vector.shape_cast %302 : vector<1x16x128xf32> to vector<16x128xf32>
    %304 = vector.shape_cast %300 : vector<16x128xf32> to vector<1x16x128xf32>
    tpu.vector_store %arg8[%301, %c0_94, %c0_95], %304 {strides = array<i32>} : memref<8x16x128xf32, #tpu.memory_space<vmem>>, vector<1x16x128xf32>,
    %c7_i32 = arith.constant 7 : i32
    %305 = arith.truncf %294 : vector<16x32xf32> to vector<16x32xbf16>
    %306 = arith.index_cast %c7_i32 : i32 to index
    %c0_96 = arith.constant 0 : index
    %c0_97 = arith.constant 0 : index
    %307 = vector.load %arg1[%306, %c0_96, %c0_97] : memref<8x16x4xbf16, #tpu.memory_space<vmem>>, vector<1x16x4xbf16>
    %308 = vector.shape_cast %307 : vector<1x16x4xbf16> to vector<16x4xbf16>
    %309 = tpu.concatenate %305, %308 in 1 : vector<16x32xbf16>, vector<16x4xbf16> -> vector<16x36xbf16>
    %cst_98 = arith.constant dense<0.000000e+00> : vector<16x36xf32>
    %310 = tpu.matmul %0, %309, %cst_98 {dimension_numbers = #tpu.dot_dimension_numbers<[1], [0], [0], [1], [0, 0, 1, 1], [], []>} : vector<16x16xbf16>, vector<16x36xbf16>, vector<16x36xf32> -> vector<16x36xf32>
    %311 = arith.truncf %310 : vector<16x36xf32> to vector<16x36xbf16>
    %312 = tpu.concatenate %308, %311, %305 in 1 : vector<16x4xbf16>, vector<16x36xbf16>, vector<16x32xbf16> -> vector<16x72xbf16>
    %cst_99 = arith.constant dense<0.000000e+00> : vector<16x96xf32>
    %313 = tpu.matmul %312, %1, %cst_99 {dimension_numbers = #tpu.dot_dimension_numbers<[1], [0], [0], [1], [0, 0, 1, 1], [], []>} : vector<16x72xbf16>, vector<72x96xbf16>, vector<16x96xf32> -> vector<16x96xf32>
    %314 = arith.addf %313, %6 : vector<16x96xf32>
    %315 = vector.extract_strided_slice %314 {offsets = [0, 0], sizes = [16, 64], strides = [1, 1]} : vector<16x96xf32> to vector<16x64xf32>
    %316 = arith.negf %315 : vector<16x64xf32>
    %317 = math.exp %316 : vector<16x64xf32>
    %cst_100 = arith.constant 1.000000e+00 : f32
    %318 = vector.broadcast %cst_100 : f32 to vector<16x64xf32>
    %319 = arith.addf %318, %317 : vector<16x64xf32>
    %320 = arith.divf %318, %319 : vector<16x64xf32>
    %321 = vector.extract_strided_slice %320 {offsets = [0, 0], sizes = [16, 32], strides = [1, 1]} : vector<16x64xf32> to vector<16x32xf32>
    %322 = vector.extract_strided_slice %320 {offsets = [0, 32], sizes = [16, 32], strides = [1, 1]} : vector<16x64xf32> to vector<16x32xf32>
    %323 = arith.mulf %294, %322 : vector<16x32xf32>
    %324 = arith.truncf %323 : vector<16x32xf32> to vector<16x32xbf16>
    %cst_101 = arith.constant dense<0.000000e+00> : vector<16x32xf32>
    %325 = tpu.matmul %0, %324, %cst_101 {dimension_numbers = #tpu.dot_dimension_numbers<[1], [0], [0], [1], [0, 0, 1, 1], [], []>} : vector<16x16xbf16>, vector<16x32xbf16>, vector<16x32xf32> -> vector<16x32xf32>
    %326 = vector.extract_strided_slice %314 {offsets = [0, 64], sizes = [16, 32], strides = [1, 1]} : vector<16x96xf32> to vector<16x32xf32>
    %327 = arith.truncf %325 : vector<16x32xf32> to vector<16x32xbf16>
    %328 = tpu.concatenate %324, %327 in 1 : vector<16x32xbf16>, vector<16x32xbf16> -> vector<16x64xbf16>
    %cst_102 = arith.constant dense<0.000000e+00> : vector<16x32xf32>
    %329 = tpu.matmul %328, %2, %cst_102 {dimension_numbers = #tpu.dot_dimension_numbers<[1], [0], [0], [1], [0, 0, 1, 1], [], []>} : vector<16x64xbf16>, vector<64x32xbf16>, vector<16x32xf32> -> vector<16x32xf32>
    %330 = arith.addf %326, %329 : vector<16x32xf32>
    %331 = math.tanh %330 : vector<16x32xf32>
    %332 = arith.mulf %321, %294 : vector<16x32xf32>
    %cst_103 = arith.constant 1.000000e+00 : f32
    %333 = vector.broadcast %cst_103 : f32 to vector<16x32xf32>
    %334 = arith.subf %333, %321 : vector<16x32xf32>
    %335 = arith.mulf %334, %331 : vector<16x32xf32>
    %336 = arith.addf %332, %335 : vector<16x32xf32>
    %cst_104 = arith.constant 0.000000e+00 : f32
    %337 = vector.broadcast %cst_104 : f32 to vector<16x32xf32>
    %338 = arith.maximumf %336, %337 : vector<16x32xf32>
    %339 = arith.truncf %338 : vector<16x32xf32> to vector<16x32xbf16>
    %cst_105 = arith.constant dense<0.000000e+00> : vector<16x96xf32>
    %340 = tpu.matmul %339, %3, %cst_105 {dimension_numbers = #tpu.dot_dimension_numbers<[1], [0], [0], [1], [0, 0, 1, 1], [], []>} : vector<16x32xbf16>, vector<32x96xbf16>, vector<16x96xf32> -> vector<16x96xf32>
    %341 = arith.addf %340, %9 : vector<16x96xf32>
    %342 = tpu.concatenate %336, %341 in 1 : vector<16x32xf32>, vector<16x96xf32> -> vector<16x128xf32>
    %343 = arith.index_cast %c7_i32 : i32 to index
    %c0_106 = arith.constant 0 : index
    %c0_107 = arith.constant 0 : index
    %344 = vector.load %arg8[%343, %c0_106, %c0_107] : memref<8x16x128xf32, #tpu.memory_space<vmem>>, vector<1x16x128xf32>
    %345 = vector.shape_cast %344 : vector<1x16x128xf32> to vector<16x128xf32>
    %346 = vector.shape_cast %342 : vector<16x128xf32> to vector<1x16x128xf32>
    tpu.vector_store %arg8[%343, %c0_106, %c0_107], %346 {strides = array<i32>} : memref<8x16x128xf32, #tpu.memory_space<vmem>>, vector<1x16x128xf32>,
    %c8_i32 = arith.constant 8 : i32
    return
  }
}

</mosaic_0001>

<bundles_post_ra>
// kernel: tpu_custom_call.1
= control target key start
LH: loop header
LB: loop body
LE: loop exit
PB: predicated region body
PF: predicated region fallthrough
CT: control target
= control target key end

     0   :  { %s3435_s29 = smov 32   ;;  %v3436_v1 = vmov 0.0   ;;  %vm3437_vm0 = vmmov 0   ;;  %s4428_s0 = inlined_call_operand.vmem [shape: bf16[16,16], index: 0, kind: input, shape index: {}]   ;;  %s4429_s1 = inlined_call_operand.vmem [shape: bf16[8,16,4], index: 1, kind: input, shape index: {}]   ;;  %s4430_s2 = inlined_call_operand.vmem [shape: f32[16,32], index: 2, kind: input, shape index: {}]   ;;  %s4431_s3 = inlined_call_operand.vmem [shape: bf16[72,96], index: 3, kind: input, shape index: {}]   ;;  %s4432_s4 = inlined_call_operand.vmem [shape: f32[1,96], index: 4, kind: input, shape index: {}]   ;;  %s4433_s5 = inlined_call_operand.vmem [shape: bf16[64,32], index: 5, kind: input, shape index: {}]   ;;  %s4434_s6 = inlined_call_operand.vmem [shape: bf16[32,96], index: 6, kind: input, shape index: {}]   ;;  %s4435_s7 = inlined_call_operand.vmem [shape: f32[1,96], index: 7, kind: input, shape index: {}]   ;;  %s4436_s8 = inlined_call_operand.hbm [shape: f32[8,16,128], index: 8, kind: output, shape index: {}]  }
   0x1   :  { %v3283_v0 = vld [vmem:[%s4429_s1] sm:$0xff]   ;;  %2905 = vmatprep.subr.bf16.mxu0 %v3436_v1  ;;  %2907 = vmatprep.mubr.msk.bf16.mxu0 %vm3437_vm0, %v3436_v1 }
   0x2   :  { %78 = vrot.lane.b32.xlu0 %v3283_v0, %s3435_s29  ;;  %2911 = vmatprep.subr.bf16.mxu1 %v3436_v1 }
   0x3   :  { %2921 = vmatprep.mubr.msk.bf16.mxu1 %vm3437_vm0, %v3436_v1 }
   0x4   :  { %13 = vsyncpa [#allocation3], 0  ;;  %v3503_v2 = vld [vmem:[%s4430_s2] sm:$0xff]  ;;  %v3508_v3 = vld [vmem:[%s4430_s2 + $0x8] sm:$0xff]  ;;  %vm80_vm1 = vcmask 261120   ;;  %vm90_vm2 = vcmask 130048  }
   0x5   :  { %v70_v4 = vpack.c.bf16 %v3508_v3, %v3503_v2  ;;  %v3516_v7 = vld [vmem:[%s4428_s0] sm:$0xff]   ;;  %s3438_s15 = smov 40   ;;  %v3533_v9 = vld [vmem:[%s4431_s3 + $0x8] sm:$0xff]   ;;  %v3540_v10 = vld [vmem:[%s4431_s3 + $0x10] sm:$0xff]   ;;  %vm179_vm3 = vcmask 1043456   ;;  %s3439_s24 = smov 4  }
   0x6   :  { %v3526_v8 = vld [vmem:[%s4431_s3] sm:$0xff]   ;;  %v3547_v11 = vld [vmem:[%s4431_s3 + $0x18] sm:$0xff]   ;;  %vm142_vm4 = vcmask 31744   ;;  %vm146_vm5 = vcmask 326656   ;;  %vm176_vm6 = vcmask 588800   ;;  %s3440_s27 = smov 96  }
   0x7   :  { %140 = vrot.lane.b32.xlu1 %v70_v4, %s3438_s15  ;;  %2912 = vmatpush3.bf16.msra.mxu1 %v3526_v8  ;;  %v3289_v12 = vld [vmem:[%s4431_s3 + $0x20] ss:$0 sps:$4 sm:$0xff]   ;;  %v3596_v44 = vld [vmem:[%s4433_s5 + $0x8] sm:$0xff]   ;;  %v3603_v45 = vld [vmem:[%s4433_s5 + $0x10] sm:$0xff]   ;;  %vm319_vm7 = vcmask 523264   ;;  %s3441_s14 = smov 64  }
   0x8   :  { %2913 = vmatprep.subr.bf16.mxu1 %v3436_v1  ;;  %v3555_v13 = vsel %vm179_vm3, %v3289_v12, 0  ;;  %v3568_v23 = vld [vmem:[%s4432_s4] ss:$0 sm:$0xff]  ;;  %v3610_v46 = vld [vmem:[%s4433_s5 + $0x18] sm:$0xff]   ;;  %v3632_v63 = vld [vmem:[%s4434_s6 + $0x8] sm:$0xff]  }
   0x9   :  { %v3590_v43 = vld [vmem:[%s4433_s5] sm:$0xff]  }
   0xa   :  { %v3625_v61 = vld [vmem:[%s4434_s6] sm:$0xff]  }
   0xb   :  { %2914 = vmatpush3.bf16.msra.mxu1 %v3533_v9 }
   0xc   :  { %2915 = vmatprep.subr.bf16.mxu1 %v3436_v1 }
   0xf   :  { %2916 = vmatpush3.bf16.msra.mxu1 %v3540_v10 }
  0x10   :  { %2917 = vmatprep.subr.bf16.mxu1 %v3436_v1 }
  0x13   :  { %2918 = vmatpush3.bf16.msra.mxu1 %v3547_v11 }
  0x14   :  { %2919 = vmatprep.subr.bf16.mxu1 %v3436_v1 }
  0x17   :  { %2920 = vmatpush3.bf16.msra.mxu1 %v3555_v13 }
  0x18   :  { %2943 = vmatprep.subr.bf16.mxu1 %v3436_v1 }
  0x74   :  { %v79_v5 = vpop.permute.xlu0 %78 }
  0x75   :  { %v83_v6 = vsel %vm80_vm1, %v70_v4, %v79_v5  ;;  %v3294_v4 = vld [vmem:[%s4429_s1 + $0x8] sm:$0xff]  }
  0x76   :  { %2906 = vmatpush3.bf16.msra.mxu0 %v83_v6 }
  0x77   :  { %2925 = vmatprep.subr.bf16.mxu0 %v3436_v1 }
  0x79   :  { %2908 = vmatmul.mubr.msk.bf16.vlgmr.msra.gmra.mrb[0].mxu0 %vm90_vm2, %v3516_v7  ;;  %v141_v19 = vpop.permute.xlu1 %140 }
  0x7a   :  { %2927 = vmatprep.mubr.msk.bf16.mxu0 %vm3437_vm0, %v3436_v1 }
 0x14c   :  { %v128_v14 = vpop.f32.mrb[0].mxu0 }
 0x14d   :  { %v2909_v15 = vpop.f32.mrb[1].mxu0 }
 0x14e   :  { %v131_v16 = vpop.f32.mrb[2].mxu0 }
 0x14f   :  { %v135_v17 = vpack.c.bf16 %v131_v16, %v128_v14  ;;  %v2910_v18 = vpop.f32.mrb[3].mxu0 }
 0x151   :  { %137 = vrot.lane.b32.xlu0 %v135_v17, %s3439_s24 }
 0x1c3   :  { %v138_v20 = vpop.permute.xlu0 %137 }
 0x1c4   :  { %v145_v21 = vsel %vm142_vm4, %v3283_v0, %v138_v20 }
 0x1c5   :  { %v148_v22 = vsel %vm146_vm5, %v145_v21, %v141_v19 }
 0x1c6   :  { %2922 = vmatmul.mubr.msk.bf16.vlgmr.msra.gmra.mrb[0].mxu1 %vm176_vm6, %v148_v22 }
 0x1c7   :  { %2947 = vmatprep.mubr.msk.bf16.mxu1 %vm3437_vm0, %v3436_v1  ;;  %2944 = vmatpush3.bf16.msra.mxu1 %v3625_v61 }
 0x1c8   :  { %2945 = vmatprep.subr.bf16.mxu1 %v3436_v1 }
 0x1cb   :  { %2946 = vmatpush3.bf16.msra.mxu1 %v3632_v63 }
 0x1cc   :  { %2957 = vmatprep.subr.bf16.mxu1 %v3436_v1 }
 0x299   :  { %v217_v24 = vpop.f32.mrb[0].mxu1 }
 0x29a   :  { %v218_v25 = vadd.f32 %v3568_v23, %v217_v24  ;;  %v2923_v26 = vpop.f32.mrb[1].mxu1 }
 0x29b   :  { %v220_v27 = vpop.f32.mrb[2].mxu1 }
 0x29c   :  { %v2680_v28 = vmul.f32 -1.442695, %v218_v25  ;;  %v221_v29 = vadd.f32 %v3568_v23, %v220_v27  ;;  %v2924_v30 = vpop.f32.mrb[3].mxu1 }
 0x29e   :  { %3303 = vpow2.f32 %v2680_v28  ;;  %v2681_v31 = vmul.f32 -1.442695, %v221_v29 }
 0x2a0   :  { %3305 = vpow2.f32 %v2681_v31 }
 0x2a8   :  { %v3304_v32 = vpop.eup %3303 }
 0x2a9   :  { %v230_v33 = vadd.f32 1.0, %v3304_v32 }
 0x2aa   :  { %v3306_v34 = vpop.eup %3305 }
 0x2ab   :  { %3307 = vrcp.f32 %v230_v33  ;;  %v231_v35 = vadd.f32 1.0, %v3306_v34 }
 0x2ad   :  { %3309 = vrcp.f32 %v231_v35 }
 0x2b5   :  { %v3572_v36 = vpop.eup %3307 }
 0x2b6   :  { %238 = vrot.lane.b32.xlu1 %v3572_v36, %s3440_s27  ;;  %v377_v6 = vsub.f32 1.0, %v3572_v36  ;;  %v375_v14 = vmul.f32 %v3572_v36, %v3503_v2 }
 0x2b7   :  { %v3576_v37 = vpop.eup %3309 }
 0x2b8   :  { %240 = vrot.lane.b32.xlu0 %v3576_v37, %s3440_s27  ;;  %v378_v16 = vsub.f32 1.0, %v3576_v37  ;;  %v376_v19 = vmul.f32 %v3576_v37, %v3508_v3 }
 0x328   :  { %v239_v38 = vpop.permute.xlu1 %238 }
 0x329   :  { %v244_v40 = vmul.f32 %v239_v38, %v3503_v2 }
 0x32a   :  { %v241_v39 = vpop.permute.xlu0 %240 }
 0x32b   :  { %v245_v41 = vmul.f32 %v241_v39, %v3508_v3 }
 0x32d   :  { %v246_v42 = vpack.c.bf16 %v245_v41, %v244_v40 }
 0x32f   :  { %2926 = vmatpush3.bf16.msra.mxu0 %v246_v42 }
 0x330   :  { %2931 = vmatprep.subr.bf16.mxu0 %v3436_v1 }
 0x332   :  { %2928 = vmatmul.mubr.msk.bf16.vlgmr.msra.gmra.mrb[4].mxu0 %vm90_vm2, %v3516_v7 }
 0x333   :  { %2939 = vmatprep.mubr.msk.bf16.mxu0 %vm3437_vm0, %v3436_v1  ;;  %2932 = vmatpush3.bf16.msra.mxu0 %v3590_v43 }
 0x334   :  { %2933 = vmatprep.subr.bf16.mxu0 %v3436_v1 }
 0x337   :  { %2934 = vmatpush3.bf16.msra.mxu0 %v3596_v44 }
 0x338   :  { %2935 = vmatprep.subr.bf16.mxu0 %v3436_v1 }
 0x33b   :  { %2936 = vmatpush3.bf16.msra.mxu0 %v3603_v45 }
 0x33c   :  { %2937 = vmatprep.subr.bf16.mxu0 %v3436_v1 }
 0x33f   :  { %2938 = vmatpush3.bf16.msra.mxu0 %v3610_v46 }
 0x340   :  { %2951 = vmatprep.subr.bf16.mxu0 %v3436_v1 }
 0x405   :  { %v281_v47 = vpop.f32.mrb[4].mxu0 }
 0x406   :  { %v2929_v48 = vpop.f32.mrb[5].mxu0 }
 0x407   :  { %v284_v49 = vpop.f32.mrb[6].mxu0 }
 0x408   :  { %v288_v50 = vpack.c.bf16 %v284_v49, %v281_v47  ;;  %v2930_v51 = vpop.f32.mrb[7].mxu0 }
 0x40a   :  { %290 = vrot.lane.b32.xlu1 %v288_v50, %s3435_s29 }
 0x47c   :  { %v291_v52 = vpop.permute.xlu1 %290 }
 0x47d   :  { %v294_v53 = vsel %vm80_vm1, %v246_v42, %v291_v52 }
 0x47e   :  { %2940 = vmatmul.mubr.msk.bf16.vlgmr.msra.gmra.mrb[8].mxu0 %vm319_vm7, %v294_v53 }
 0x47f   :  { %2953 = vmatprep.mubr.msk.bf16.mxu0 %vm3437_vm0, %v3436_v1 }
 0x551   :  { %v356_v54 = vpop.f32.mrb[8].mxu0 }
 0x552   :  { %365 = vrot.lane.b32.xlu0 %v356_v54, %s3441_s14  ;;  %v2941_v55 = vpop.f32.mrb[9].mxu0 }
 0x553   :  { %v359_v56 = vpop.f32.mrb[10].mxu0 }
 0x554   :  { %367 = vrot.lane.b32.xlu1 %v359_v56, %s3441_s14  ;;  %v2942_v57 = vpop.f32.mrb[11].mxu0 }
 0x5c4   :  { %v366_v58 = vpop.permute.xlu0 %365 }
 0x5c5   :  { %v371_v59 = vadd.f32 %v366_v58, %v218_v25 }
 0x5c6   :  { %v368_v60 = vpop.permute.xlu1 %367 }
 0x5c7   :  { %3311 = vtanh.f32 %v371_v59  ;;  %v372_v62 = vadd.f32 %v368_v60, %v221_v29 }
 0x5c9   :  { %3313 = vtanh.f32 %v372_v62 }
 0x5d1   :  { %v3312_v0 = vpop.eup %3311 }
 0x5d2   :  { %381 = vrot.lane.b32.xlu0 %v3312_v0, %s3441_s14 }
 0x5d3   :  { %v3314_v5 = vpop.eup %3313 }
 0x5d4   :  { %383 = vrot.lane.b32.xlu1 %v3314_v5, %s3441_s14 }
 0x5d6   :  { %471 = vrot.lane.b32.xlu0 %v3294_v4, %s3435_s29 }
 0x644   :  { %v382_v12 = vpop.permute.xlu0 %381 }
 0x645   :  { %v387_v15 = vmul.f32 %v382_v12, %v377_v6 }
 0x646   :  { %v384_v17 = vpop.permute.xlu1 %383 }
 0x647   :  { %v3646_v18 = vadd.f32 %v387_v15, %v375_v14  ;;  %v388_v20 = vmul.f32 %v384_v17, %v378_v16 }
 0x648   :  { %v472_v22 = vpop.permute.xlu0 %471 }
 0x649   :  { %v3650_v21 = vadd.f32 %v388_v20, %v376_v19  ;;  %v391_v25 = vmax.f32 %v3646_v18, 0.0 }
 0x64b   :  { %v462_v24 = vpack.c.bf16 %v3650_v21, %v3646_v18  ;;  %v392_v2 = vmax.f32 %v3650_v21, 0.0 }
 0x64d   :  { %v475_v26 = vsel %vm80_vm1, %v462_v24, %v472_v22  ;;  %523 = vrot.lane.b32.xlu0 %v462_v24, %s3438_s15  ;;  %v393_v27 = vpack.c.bf16 %v392_v2, %v391_v25 }
 0x64e   :  { %2952 = vmatpush3.bf16.msra.mxu0 %v475_v26 }
 0x64f   :  { %2948 = vmatmul.mubr.msk.bf16.vlgmr.msra.gmra.mrb[4].mxu1 %vm80_vm1, %v393_v27  ;;  %2971 = vmatprep.subr.bf16.mxu0 %v3436_v1 }
 0x650   :  { %2958 = vmatpush3.bf16.msra.mxu1 %v3526_v8  ;;  %2967 = vmatprep.mubr.msk.bf16.mxu1 %vm3437_vm0, %v3436_v1 }
 0x651   :  { %2954 = vmatmul.mubr.msk.bf16.vlgmr.msra.gmra.mrb[12].mxu0 %vm90_vm2, %v3516_v7  ;;  %2959 = vmatprep.subr.bf16.mxu1 %v3436_v1 }
 0x652   :  { %2973 = vmatprep.mubr.msk.bf16.mxu0 %vm3437_vm0, %v3436_v1 }
 0x654   :  { %2960 = vmatpush3.bf16.msra.mxu1 %v3533_v9 }
 0x655   :  { %2961 = vmatprep.subr.bf16.mxu1 %v3436_v1 }
 0x658   :  { %2962 = vmatpush3.bf16.msra.mxu1 %v3540_v10 }
 0x659   :  { %2963 = vmatprep.subr.bf16.mxu1 %v3436_v1 }
 0x65c   :  { %2964 = vmatpush3.bf16.msra.mxu1 %v3547_v11 }
 0x65d   :  { %2965 = vmatprep.subr.bf16.mxu1 %v3436_v1 }
 0x660   :  { %2966 = vmatpush3.bf16.msra.mxu1 %v3555_v13 }
 0x661   :  { %2989 = vmatprep.subr.bf16.mxu1 %v3436_v1 }
 0x6bf   :  { %v524_v37 = vpop.permute.xlu0 %523 }
 0x722   :  { %v3676_v3 = vpop.f32.mrb[4].mxu1 }
 0x723   :  { %v2949_v28 = vpop.f32.mrb[5].mxu1 }
 0x724   :  { %v3678_v29 = vpop.f32.mrb[6].mxu1  ;;  %v511_v30 = vpop.f32.mrb[12].mxu0  ;;  %v3297_v28 = vld [vmem:[%s4429_s1 + $0x10] sm:$0xff]  }
 0x725   :  { %v2950_v31 = vpop.f32.mrb[7].mxu1  ;;  %v2955_v32 = vpop.f32.mrb[13].mxu0 }
 0x726   :  { %v514_v33 = vpop.f32.mrb[14].mxu0 }
 0x727   :  { %v518_v34 = vpack.c.bf16 %v514_v33, %v511_v30  ;;  %v2956_v35 = vpop.f32.mrb[15].mxu0 }
 0x729   :  { %520 = vrot.lane.b32.xlu1 %v518_v34, %s3439_s24 }
 0x79b   :  { %v521_v36 = vpop.permute.xlu1 %520 }
 0x79c   :  { %v527_v38 = vsel %vm142_vm4, %v3294_v4, %v521_v36 }
 0x79d   :  { %v529_v39 = vsel %vm146_vm5, %v527_v38, %v524_v37 }
 0x79e   :  { %2968 = vmatmul.mubr.msk.bf16.vlgmr.msra.gmra.mrb[8].mxu1 %vm176_vm6, %v529_v39 }
 0x79f   :  { %2990 = vmatpush3.bf16.msra.mxu1 %v3625_v61  ;;  %2993 = vmatprep.mubr.msk.bf16.mxu1 %vm3437_vm0, %v3436_v1 }
 0x7a0   :  { %2991 = vmatprep.subr.bf16.mxu1 %v3436_v1 }
 0x7a3   :  { %2992 = vmatpush3.bf16.msra.mxu1 %v3632_v63 }
 0x7a4   :  { %2997 = vmatprep.subr.bf16.mxu1 %v3436_v1 }
 0x871   :  { %v566_v40 = vpop.f32.mrb[8].mxu1 }
 0x872   :  { %v3691_v41 = vadd.f32 %v3568_v23, %v566_v40  ;;  %v2969_v42 = vpop.f32.mrb[9].mxu1 }
 0x873   :  { %v569_v47 = vpop.f32.mrb[10].mxu1 }
 0x874   :  { %v2696_v48 = vmul.f32 -1.442695, %v3691_v41  ;;  %v570_v49 = vadd.f32 %v3568_v23, %v569_v47  ;;  %v2970_v50 = vpop.f32.mrb[11].mxu1 }
 0x876   :  { %3315 = vpow2.f32 %v2696_v48  ;;  %v2697_v51 = vmul.f32 -1.442695, %v570_v49 }
 0x878   :  { %3317 = vpow2.f32 %v2697_v51 }
 0x880   :  { %v3316_v52 = vpop.eup %3315 }
 0x881   :  { %v579_v53 = vadd.f32 1.0, %v3316_v52 }
 0x882   :  { %v3318_v54 = vpop.eup %3317 }
 0x883   :  { %3319 = vrcp.f32 %v579_v53  ;;  %v580_v55 = vadd.f32 1.0, %v3318_v54 }
 0x885   :  { %3321 = vrcp.f32 %v580_v55 }
 0x88d   :  { %v3695_v56 = vpop.eup %3319 }
 0x88e   :  { %587 = vrot.lane.b32.xlu1 %v3695_v56, %s3440_s27  ;;  %v701_v31 = vsub.f32 1.0, %v3695_v56  ;;  %v699_v33 = vmul.f32 %v3695_v56, %v3646_v18 }
 0x88f   :  { %v3699_v57 = vpop.eup %3321 }
 0x890   :  { %589 = vrot.lane.b32.xlu0 %v3699_v57, %s3440_s27  ;;  %v702_v35 = vsub.f32 1.0, %v3699_v57  ;;  %v700_v38 = vmul.f32 %v3699_v57, %v3650_v21 }
 0x900   :  { %v588_v58 = vpop.permute.xlu1 %587 }
 0x901   :  { %v593_v60 = vmul.f32 %v588_v58, %v3646_v18 }
 0x902   :  { %v590_v59 = vpop.permute.xlu0 %589 }
 0x903   :  { %v594_v62 = vmul.f32 %v590_v59, %v3650_v21 }
 0x905   :  { %v595_v0 = vpack.c.bf16 %v594_v62, %v593_v60 }
 0x907   :  { %2972 = vmatpush3.bf16.msra.mxu0 %v595_v0 }
 0x908   :  { %2977 = vmatprep.subr.bf16.mxu0 %v3436_v1 }
 0x90a   :  { %2974 = vmatmul.mubr.msk.bf16.vlgmr.msra.gmra.mrb[16].mxu0 %vm90_vm2, %v3516_v7 }
 0x90b   :  { %2978 = vmatpush3.bf16.msra.mxu0 %v3590_v43  ;;  %2985 = vmatprep.mubr.msk.bf16.mxu0 %vm3437_vm0, %v3436_v1 }
 0x90c   :  { %2979 = vmatprep.subr.bf16.mxu0 %v3436_v1 }
 0x90f   :  { %2980 = vmatpush3.bf16.msra.mxu0 %v3596_v44 }
 0x910   :  { %2981 = vmatprep.subr.bf16.mxu0 %v3436_v1 }
 0x913   :  { %2982 = vmatpush3.bf16.msra.mxu0 %v3603_v45 }
 0x914   :  { %2983 = vmatprep.subr.bf16.mxu0 %v3436_v1 }
 0x917   :  { %2984 = vmatpush3.bf16.msra.mxu0 %v3610_v46 }
 0x918   :  { %3003 = vmatprep.subr.bf16.mxu0 %v3436_v1 }
 0x9dd   :  { %v630_v4 = vpop.f32.mrb[16].mxu0 }
 0x9de   :  { %v2975_v5 = vpop.f32.mrb[17].mxu0 }
 0x9df   :  { %v633_v6 = vpop.f32.mrb[18].mxu0 }
 0x9e0   :  { %v637_v12 = vpack.c.bf16 %v633_v6, %v630_v4  ;;  %v2976_v14 = vpop.f32.mrb[19].mxu0 }
 0x9e2   :  { %639 = vrot.lane.b32.xlu1 %v637_v12, %s3435_s29 }
 0xa54   :  { %v640_v15 = vpop.permute.xlu1 %639 }
 0xa55   :  { %v643_v16 = vsel %vm80_vm1, %v595_v0, %v640_v15 }
 0xa56   :  { %2986 = vmatmul.mubr.msk.bf16.vlgmr.msra.gmra.mrb[20].mxu0 %vm319_vm7, %v643_v16 }
 0xa57   :  { %3004 = vmatpush3.bf16.msra.mxu0 %v3526_v8  ;;  %3013 = vmatprep.mubr.msk.bf16.mxu0 %vm3437_vm0, %v3436_v1 }
 0xa58   :  { %3005 = vmatprep.subr.bf16.mxu0 %v3436_v1 }
 0xa5b   :  { %3006 = vmatpush3.bf16.msra.mxu0 %v3533_v9 }
 0xa5c   :  { %3007 = vmatprep.subr.bf16.mxu0 %v3436_v1 }
 0xa5f   :  { %3008 = vmatpush3.bf16.msra.mxu0 %v3540_v10 }
 0xa60   :  { %3009 = vmatprep.subr.bf16.mxu0 %v3436_v1 }
 0xa63   :  { %3010 = vmatpush3.bf16.msra.mxu0 %v3547_v11 }
 0xa64   :  { %3011 = vmatprep.subr.bf16.mxu0 %v3436_v1 }
 0xa67   :  { %3012 = vmatpush3.bf16.msra.mxu0 %v3555_v13 }
 0xa68   :  { %3035 = vmatprep.subr.bf16.mxu0 %v3436_v1 }
 0xb29   :  { %v680_v17 = vpop.f32.mrb[20].mxu0 }
 0xb2a   :  { %689 = vrot.lane.b32.xlu0 %v680_v17, %s3441_s14  ;;  %v2987_v19 = vpop.f32.mrb[21].mxu0 }
 0xb2b   :  { %v683_v20 = vpop.f32.mrb[22].mxu0 }
 0xb2c   :  { %691 = vrot.lane.b32.xlu1 %v683_v20, %s3441_s14  ;;  %v2988_v22 = vpop.f32.mrb[23].mxu0 }
 0xb9c   :  { %v690_v24 = vpop.permute.xlu0 %689 }
 0xb9d   :  { %v695_v25 = vadd.f32 %v690_v24, %v3691_v41 }
 0xb9e   :  { %v692_v2 = vpop.permute.xlu1 %691 }
 0xb9f   :  { %3323 = vtanh.f32 %v695_v25  ;;  %v696_v26 = vadd.f32 %v692_v2, %v570_v49 }
 0xba1   :  { %3325 = vtanh.f32 %v696_v26 }
 0xba9   :  { %v3324_v27 = vpop.eup %3323 }
 0xbaa   :  { %705 = vrot.lane.b32.xlu0 %v3324_v27, %s3441_s14 }
 0xbab   :  { %v3326_v30 = vpop.eup %3325 }
 0xbac   :  { %707 = vrot.lane.b32.xlu1 %v3326_v30, %s3441_s14 }
 0xbae   :  { %784 = vrot.lane.b32.xlu0 %v3297_v28, %s3435_s29 }
 0xc1c   :  { %v706_v32 = vpop.permute.xlu0 %705 }
 0xc1d   :  { %v711_v34 = vmul.f32 %v706_v32, %v701_v31 }
 0xc1e   :  { %v708_v36 = vpop.permute.xlu1 %707 }
 0xc1f   :  { %v3746_v37 = vadd.f32 %v711_v34, %v699_v33  ;;  %v712_v39 = vmul.f32 %v708_v36, %v702_v35 }
 0xc20   :  { %v785_v41 = vpop.permute.xlu0 %784 }
 0xc21   :  { %v3750_v40 = vadd.f32 %v712_v39, %v700_v38  ;;  %v715_v47 = vmax.f32 %v3746_v37, 0.0 }
 0xc23   :  { %v775_v42 = vpack.c.bf16 %v3750_v40, %v3746_v37  ;;  %v716_v48 = vmax.f32 %v3750_v40, 0.0 }
 0xc25   :  { %v788_v49 = vsel %vm80_vm1, %v775_v42, %v785_v41  ;;  %836 = vrot.lane.b32.xlu0 %v775_v42, %s3438_s15  ;;  %v717_v50 = vpack.c.bf16 %v716_v48, %v715_v47 }
 0xc27   :  { %2994 = vmatmul.mubr.msk.bf16.vlgmr.msra.gmra.mrb[12].mxu1 %vm80_vm1, %v717_v50 }
 0xc28   :  { %2998 = vmatpush3.bf16.msra.mxu1 %v788_v49  ;;  %2999 = vmatprep.mubr.msk.bf16.mxu1 %vm3437_vm0, %v3436_v1 }
 0xc29   :  { %3017 = vmatprep.subr.bf16.mxu1 %v3436_v1 }
 0xc2f   :  { %3000 = vmatmul.mubr.msk.bf16.vlgmr.msra.gmra.mrb[16].mxu1 %vm90_vm2, %v3516_v7 }
 0xc30   :  { %3019 = vmatprep.mubr.msk.bf16.mxu1 %vm3437_vm0, %v3436_v1 }
 0xc97   :  { %v837_v62 = vpop.permute.xlu0 %836 }
 0xcfa   :  { %v3766_v51 = vpop.f32.mrb[12].mxu1 }
 0xcfb   :  { %v2995_v52 = vpop.f32.mrb[13].mxu1 }
 0xcfc   :  { %v3768_v53 = vpop.f32.mrb[14].mxu1 }
 0xcfd   :  { %v2996_v54 = vpop.f32.mrb[15].mxu1 }
 0xd02   :  { %v824_v55 = vpop.f32.mrb[16].mxu1 }
 0xd03   :  { %v3001_v56 = vpop.f32.mrb[17].mxu1 }
 0xd04   :  { %v827_v57 = vpop.f32.mrb[18].mxu1 }
 0xd05   :  { %v831_v58 = vpack.c.bf16 %v827_v57, %v824_v55  ;;  %v3002_v59 = vpop.f32.mrb[19].mxu1  ;;  %v3298_v57 = vld [vmem:[%s4429_s1 + $0x18] sm:$0xff]  }
 0xd07   :  { %833 = vrot.lane.b32.xlu1 %v831_v58, %s3439_s24 }
 0xd79   :  { %v834_v60 = vpop.permute.xlu1 %833 }
 0xd7a   :  { %v840_v0 = vsel %vm142_vm4, %v3297_v28, %v834_v60 }
 0xd7b   :  { %v842_v4 = vsel %vm146_vm5, %v840_v0, %v837_v62 }
 0xd7c   :  { %3014 = vmatmul.mubr.msk.bf16.vlgmr.msra.gmra.mrb[24].mxu0 %vm176_vm6, %v842_v4 }
 0xd7d   :  { %3036 = vmatpush3.bf16.msra.mxu0 %v3625_v61  ;;  %3039 = vmatprep.mubr.msk.bf16.mxu0 %vm3437_vm0, %v3436_v1 }
 0xd7e   :  { %3037 = vmatprep.subr.bf16.mxu0 %v3436_v1 }
 0xd81   :  { %3038 = vmatpush3.bf16.msra.mxu0 %v3632_v63 }
 0xd82   :  { %3043 = vmatprep.subr.bf16.mxu0 %v3436_v1 }
 0xe4f   :  { %v879_v5 = vpop.f32.mrb[24].mxu0 }
 0xe50   :  { %v3781_v6 = vadd.f32 %v3568_v23, %v879_v5  ;;  %v3015_v12 = vpop.f32.mrb[25].mxu0 }
 0xe51   :  { %v882_v14 = vpop.f32.mrb[26].mxu0 }
 0xe52   :  { %v2706_v15 = vmul.f32 -1.442695, %v3781_v6  ;;  %v883_v16 = vadd.f32 %v3568_v23, %v882_v14  ;;  %v3016_v17 = vpop.f32.mrb[27].mxu0 }
 0xe54   :  { %3327 = vpow2.f32 %v2706_v15  ;;  %v2707_v19 = vmul.f32 -1.442695, %v883_v16 }
 0xe56   :  { %3329 = vpow2.f32 %v2707_v19 }
 0xe5e   :  { %v3328_v20 = vpop.eup %3327 }
 0xe5f   :  { %v892_v22 = vadd.f32 1.0, %v3328_v20 }
 0xe60   :  { %v3330_v24 = vpop.eup %3329 }
 0xe61   :  { %3331 = vrcp.f32 %v892_v22  ;;  %v893_v25 = vadd.f32 1.0, %v3330_v24 }
 0xe63   :  { %3333 = vrcp.f32 %v893_v25 }
 0xe6b   :  { %v3785_v2 = vpop.eup %3331 }
 0xe6c   :  { %900 = vrot.lane.b32.xlu1 %v3785_v2, %s3440_s27  ;;  %v1014_v59 = vsub.f32 1.0, %v3785_v2  ;;  %v1012_v62 = vmul.f32 %v3785_v2, %v3746_v37 }
 0xe6d   :  { %v3789_v26 = vpop.eup %3333 }
 0xe6e   :  { %902 = vrot.lane.b32.xlu0 %v3789_v26, %s3440_s27  ;;  %v1015_v4 = vsub.f32 1.0, %v3789_v26  ;;  %v1013_v12 = vmul.f32 %v3789_v26, %v3750_v40 }
 0xede   :  { %v901_v27 = vpop.permute.xlu1 %900 }
 0xedf   :  { %v906_v30 = vmul.f32 %v901_v27, %v3746_v37 }
 0xee0   :  { %v903_v28 = vpop.permute.xlu0 %902 }
 0xee1   :  { %v907_v31 = vmul.f32 %v903_v28, %v3750_v40 }
 0xee3   :  { %v908_v32 = vpack.c.bf16 %v907_v31, %v906_v30 }
 0xee5   :  { %3018 = vmatpush3.bf16.msra.mxu1 %v908_v32 }
 0xee6   :  { %3023 = vmatprep.subr.bf16.mxu1 %v3436_v1 }
 0xee8   :  { %3020 = vmatmul.mubr.msk.bf16.vlgmr.msra.gmra.mrb[20].mxu1 %vm90_vm2, %v3516_v7 }
 0xee9   :  { %3024 = vmatpush3.bf16.msra.mxu1 %v3590_v43  ;;  %3031 = vmatprep.mubr.msk.bf16.mxu1 %vm3437_vm0, %v3436_v1 }
 0xeea   :  { %3025 = vmatprep.subr.bf16.mxu1 %v3436_v1 }
 0xeed   :  { %3026 = vmatpush3.bf16.msra.mxu1 %v3596_v44 }
 0xeee   :  { %3027 = vmatprep.subr.bf16.mxu1 %v3436_v1 }
 0xef1   :  { %3028 = vmatpush3.bf16.msra.mxu1 %v3603_v45 }
 0xef2   :  { %3029 = vmatprep.subr.bf16.mxu1 %v3436_v1 }
 0xef5   :  { %3030 = vmatpush3.bf16.msra.mxu1 %v3610_v46 }
 0xef6   :  { %3049 = vmatprep.subr.bf16.mxu1 %v3436_v1 }
 0xfbb   :  { %v943_v33 = vpop.f32.mrb[20].mxu1 }
 0xfbc   :  { %v3021_v34 = vpop.f32.mrb[21].mxu1 }
 0xfbd   :  { %v946_v35 = vpop.f32.mrb[22].mxu1 }
 0xfbe   :  { %v950_v36 = vpack.c.bf16 %v946_v35, %v943_v33  ;;  %v3022_v38 = vpop.f32.mrb[23].mxu1 }
 0xfc0   :  { %952 = vrot.lane.b32.xlu1 %v950_v36, %s3435_s29 }
0x1032   :  { %v953_v39 = vpop.permute.xlu1 %952 }
0x1033   :  { %v956_v41 = vsel %vm80_vm1, %v908_v32, %v953_v39 }
0x1034   :  { %3032 = vmatmul.mubr.msk.bf16.vlgmr.msra.gmra.mrb[24].mxu1 %vm319_vm7, %v956_v41 }
0x1035   :  { %3050 = vmatpush3.bf16.msra.mxu1 %v3526_v8  ;;  %3059 = vmatprep.mubr.msk.bf16.mxu1 %vm3437_vm0, %v3436_v1 }
0x1036   :  { %3051 = vmatprep.subr.bf16.mxu1 %v3436_v1 }
0x1039   :  { %3052 = vmatpush3.bf16.msra.mxu1 %v3533_v9 }
0x103a   :  { %3053 = vmatprep.subr.bf16.mxu1 %v3436_v1 }
0x103d   :  { %3054 = vmatpush3.bf16.msra.mxu1 %v3540_v10 }
0x103e   :  { %3055 = vmatprep.subr.bf16.mxu1 %v3436_v1 }
0x1041   :  { %3056 = vmatpush3.bf16.msra.mxu1 %v3547_v11 }
0x1042   :  { %3057 = vmatprep.subr.bf16.mxu1 %v3436_v1 }
0x1045   :  { %3058 = vmatpush3.bf16.msra.mxu1 %v3555_v13 }
0x1046   :  { %3081 = vmatprep.subr.bf16.mxu1 %v3436_v1 }
0x1107   :  { %v993_v42 = vpop.f32.mrb[24].mxu1 }
0x1108   :  { %1002 = vrot.lane.b32.xlu0 %v993_v42, %s3441_s14  ;;  %v3033_v47 = vpop.f32.mrb[25].mxu1 }
0x1109   :  { %v996_v48 = vpop.f32.mrb[26].mxu1 }
0x110a   :  { %1004 = vrot.lane.b32.xlu1 %v996_v48, %s3441_s14  ;;  %v3034_v49 = vpop.f32.mrb[27].mxu1 }
0x117a   :  { %v1003_v50 = vpop.permute.xlu0 %1002 }
0x117b   :  { %v1008_v52 = vadd.f32 %v1003_v50, %v3781_v6 }
0x117c   :  { %v1005_v54 = vpop.permute.xlu1 %1004 }
0x117d   :  { %3335 = vtanh.f32 %v1008_v52  ;;  %v1009_v55 = vadd.f32 %v1005_v54, %v883_v16 }
0x117f   :  { %3337 = vtanh.f32 %v1009_v55 }
0x1187   :  { %v3336_v56 = vpop.eup %3335 }
0x1188   :  { %1018 = vrot.lane.b32.xlu0 %v3336_v56, %s3441_s14 }
0x1189   :  { %v3338_v58 = vpop.eup %3337 }
0x118a   :  { %1020 = vrot.lane.b32.xlu1 %v3338_v58, %s3441_s14 }
0x118c   :  { %1097 = vrot.lane.b32.xlu0 %v3298_v57, %s3435_s29 }
0x11fa   :  { %v1019_v60 = vpop.permute.xlu0 %1018 }
0x11fb   :  { %v1024_v0 = vmul.f32 %v1019_v60, %v1014_v59 }
0x11fc   :  { %v1021_v5 = vpop.permute.xlu1 %1020 }
0x11fd   :  { %v3836_v6 = vadd.f32 %v1024_v0, %v1012_v62  ;;  %v1025_v14 = vmul.f32 %v1021_v5, %v1015_v4 }
0x11fe   :  { %v1098_v16 = vpop.permute.xlu0 %1097 }
0x11ff   :  { %v3840_v15 = vadd.f32 %v1025_v14, %v1013_v12  ;;  %v1028_v19 = vmax.f32 %v3836_v6, 0.0 }
0x1201   :  { %v1088_v17 = vpack.c.bf16 %v3840_v15, %v3836_v6  ;;  %v1029_v20 = vmax.f32 %v3840_v15, 0.0 }
0x1203   :  { %v1101_v22 = vsel %vm80_vm1, %v1088_v17, %v1098_v16  ;;  %1149 = vrot.lane.b32.xlu0 %v1088_v17, %s3438_s15  ;;  %v1030_v24 = vpack.c.bf16 %v1029_v20, %v1028_v19 }
0x1205   :  { %3040 = vmatmul.mubr.msk.bf16.vlgmr.msra.gmra.mrb[28].mxu0 %vm80_vm1, %v1030_v24 }
0x1206   :  { %3044 = vmatpush3.bf16.msra.mxu0 %v1101_v22  ;;  %3045 = vmatprep.mubr.msk.bf16.mxu0 %vm3437_vm0, %v3436_v1 }
0x1207   :  { %3063 = vmatprep.subr.bf16.mxu0 %v3436_v1 }
0x120d   :  { %3046 = vmatmul.mubr.msk.bf16.vlgmr.msra.gmra.mrb[32].mxu0 %vm90_vm2, %v3516_v7 }
0x120e   :  { %3065 = vmatprep.mubr.msk.bf16.mxu0 %vm3437_vm0, %v3436_v1 }
0x1275   :  { %v1150_v35 = vpop.permute.xlu0 %1149 }
0x12d8   :  { %v3856_v25 = vpop.f32.mrb[28].mxu0 }
0x12d9   :  { %v3041_v2 = vpop.f32.mrb[29].mxu0 }
0x12da   :  { %v3858_v26 = vpop.f32.mrb[30].mxu0 }
0x12db   :  { %v3042_v27 = vpop.f32.mrb[31].mxu0 }
0x12e0   :  { %v1137_v28 = vpop.f32.mrb[32].mxu0 }
0x12e1   :  { %v3047_v30 = vpop.f32.mrb[33].mxu0 }
0x12e2   :  { %v1140_v31 = vpop.f32.mrb[34].mxu0 }
0x12e3   :  { %v1144_v32 = vpack.c.bf16 %v1140_v31, %v1137_v28  ;;  %v3048_v33 = vpop.f32.mrb[35].mxu0  ;;  %v3299_v31 = vld [vmem:[%s4429_s1 + $0x20] sm:$0xff]  }
0x12e5   :  { %1146 = vrot.lane.b32.xlu1 %v1144_v32, %s3439_s24 }
0x1357   :  { %v1147_v34 = vpop.permute.xlu1 %1146 }
0x1358   :  { %v1153_v36 = vsel %vm142_vm4, %v3298_v57, %v1147_v34 }
0x1359   :  { %v1155_v38 = vsel %vm146_vm5, %v1153_v36, %v1150_v35 }
0x135a   :  { %3060 = vmatmul.mubr.msk.bf16.vlgmr.msra.gmra.mrb[28].mxu1 %vm176_vm6, %v1155_v38 }
0x135b   :  { %3082 = vmatpush3.bf16.msra.mxu1 %v3625_v61  ;;  %3085 = vmatprep.mubr.msk.bf16.mxu1 %vm3437_vm0, %v3436_v1 }
0x135c   :  { %3083 = vmatprep.subr.bf16.mxu1 %v3436_v1 }
0x135f   :  { %3084 = vmatpush3.bf16.msra.mxu1 %v3632_v63 }
0x1360   :  { %3089 = vmatprep.subr.bf16.mxu1 %v3436_v1 }
0x142d   :  { %v1192_v39 = vpop.f32.mrb[28].mxu1 }
0x142e   :  { %v3871_v41 = vadd.f32 %v3568_v23, %v1192_v39  ;;  %v3061_v42 = vpop.f32.mrb[29].mxu1 }
0x142f   :  { %v1195_v47 = vpop.f32.mrb[30].mxu1 }
0x1430   :  { %v2716_v48 = vmul.f32 -1.442695, %v3871_v41  ;;  %v1196_v49 = vadd.f32 %v3568_v23, %v1195_v47  ;;  %v3062_v50 = vpop.f32.mrb[31].mxu1 }
0x1432   :  { %3339 = vpow2.f32 %v2716_v48  ;;  %v2717_v52 = vmul.f32 -1.442695, %v1196_v49 }
0x1434   :  { %3341 = vpow2.f32 %v2717_v52 }
0x143c   :  { %v3340_v54 = vpop.eup %3339 }
0x143d   :  { %v1205_v55 = vadd.f32 1.0, %v3340_v54 }
0x143e   :  { %v3342_v56 = vpop.eup %3341 }
0x143f   :  { %3343 = vrcp.f32 %v1205_v55  ;;  %v1206_v57 = vadd.f32 1.0, %v3342_v56 }
0x1441   :  { %3345 = vrcp.f32 %v1206_v57 }
0x1449   :  { %v3875_v58 = vpop.eup %3343 }
0x144a   :  { %1213 = vrot.lane.b32.xlu1 %v3875_v58, %s3440_s27  ;;  %v1327_v33 = vsub.f32 1.0, %v3875_v58  ;;  %v1325_v35 = vmul.f32 %v3875_v58, %v3836_v6 }
0x144b   :  { %v3879_v59 = vpop.eup %3345 }
0x144c   :  { %1215 = vrot.lane.b32.xlu0 %v3879_v59, %s3440_s27  ;;  %v1328_v38 = vsub.f32 1.0, %v3879_v59  ;;  %v1326_v42 = vmul.f32 %v3879_v59, %v3840_v15 }
0x14bc   :  { %v1214_v60 = vpop.permute.xlu1 %1213 }
0x14bd   :  { %v1219_v0 = vmul.f32 %v1214_v60, %v3836_v6 }
0x14be   :  { %v1216_v62 = vpop.permute.xlu0 %1215 }
0x14bf   :  { %v1220_v4 = vmul.f32 %v1216_v62, %v3840_v15 }
0x14c1   :  { %v1221_v5 = vpack.c.bf16 %v1220_v4, %v1219_v0 }
0x14c3   :  { %3064 = vmatpush3.bf16.msra.mxu0 %v1221_v5 }
0x14c4   :  { %3069 = vmatprep.subr.bf16.mxu0 %v3436_v1 }
0x14c6   :  { %3066 = vmatmul.mubr.msk.bf16.vlgmr.msra.gmra.mrb[36].mxu0 %vm90_vm2, %v3516_v7 }
0x14c7   :  { %3070 = vmatpush3.bf16.msra.mxu0 %v3590_v43  ;;  %3077 = vmatprep.mubr.msk.bf16.mxu0 %vm3437_vm0, %v3436_v1 }
0x14c8   :  { %3071 = vmatprep.subr.bf16.mxu0 %v3436_v1 }
0x14cb   :  { %3072 = vmatpush3.bf16.msra.mxu0 %v3596_v44 }
0x14cc   :  { %3073 = vmatprep.subr.bf16.mxu0 %v3436_v1 }
0x14cf   :  { %3074 = vmatpush3.bf16.msra.mxu0 %v3603_v45 }
0x14d0   :  { %3075 = vmatprep.subr.bf16.mxu0 %v3436_v1 }
0x14d3   :  { %3076 = vmatpush3.bf16.msra.mxu0 %v3610_v46 }
0x14d4   :  { %3095 = vmatprep.subr.bf16.mxu0 %v3436_v1 }
0x1599   :  { %v1256_v12 = vpop.f32.mrb[36].mxu0 }
0x159a   :  { %v3067_v14 = vpop.f32.mrb[37].mxu0 }
0x159b   :  { %v1259_v16 = vpop.f32.mrb[38].mxu0 }
0x159c   :  { %v1263_v17 = vpack.c.bf16 %v1259_v16, %v1256_v12  ;;  %v3068_v19 = vpop.f32.mrb[39].mxu0 }
0x159e   :  { %1265 = vrot.lane.b32.xlu1 %v1263_v17, %s3435_s29 }
0x1610   :  { %v1266_v20 = vpop.permute.xlu1 %1265 }
0x1611   :  { %v1269_v22 = vsel %vm80_vm1, %v1221_v5, %v1266_v20 }
0x1612   :  { %3078 = vmatmul.mubr.msk.bf16.vlgmr.msra.gmra.mrb[40].mxu0 %vm319_vm7, %v1269_v22 }
0x1613   :  { %3096 = vmatpush3.bf16.msra.mxu0 %v3526_v8  ;;  %3105 = vmatprep.mubr.msk.bf16.mxu0 %vm3437_vm0, %v3436_v1 }
0x1614   :  { %3097 = vmatprep.subr.bf16.mxu0 %v3436_v1 }
0x1617   :  { %3098 = vmatpush3.bf16.msra.mxu0 %v3533_v9 }
0x1618   :  { %3099 = vmatprep.subr.bf16.mxu0 %v3436_v1 }
0x161b   :  { %3100 = vmatpush3.bf16.msra.mxu0 %v3540_v10 }
0x161c   :  { %3101 = vmatprep.subr.bf16.mxu0 %v3436_v1 }
0x161f   :  { %3102 = vmatpush3.bf16.msra.mxu0 %v3547_v11 }
0x1620   :  { %3103 = vmatprep.subr.bf16.mxu0 %v3436_v1 }
0x1623   :  { %3104 = vmatpush3.bf16.msra.mxu0 %v3555_v13 }
0x1624   :  { %3127 = vmatprep.subr.bf16.mxu0 %v3436_v1 }
0x16e5   :  { %v1306_v8 = vpop.f32.mrb[40].mxu0 }
0x16e6   :  { %1315 = vrot.lane.b32.xlu0 %v1306_v8, %s3441_s14  ;;  %v3079_v24 = vpop.f32.mrb[41].mxu0 }
0x16e7   :  { %v1309_v2 = vpop.f32.mrb[42].mxu0 }
0x16e8   :  { %1317 = vrot.lane.b32.xlu1 %v1309_v2, %s3441_s14  ;;  %v3080_v9 = vpop.f32.mrb[43].mxu0 }
0x1758   :  { %v1316_v27 = vpop.permute.xlu0 %1315 }
0x1759   :  { %v1321_v10 = vadd.f32 %v1316_v27, %v3871_v41 }
0x175a   :  { %v1318_v28 = vpop.permute.xlu1 %1317 }
0x175b   :  { %3347 = vtanh.f32 %v1321_v10  ;;  %v1322_v11 = vadd.f32 %v1318_v28, %v1196_v49 }
0x175d   :  { %3349 = vtanh.f32 %v1322_v11 }
0x1765   :  { %v3348_v30 = vpop.eup %3347 }
0x1766   :  { %1331 = vrot.lane.b32.xlu0 %v3348_v30, %s3441_s14 }
0x1767   :  { %v3350_v32 = vpop.eup %3349 }
0x1768   :  { %1333 = vrot.lane.b32.xlu1 %v3350_v32, %s3441_s14 }
0x176a   :  { %1410 = vrot.lane.b32.xlu0 %v3299_v31, %s3435_s29 }
0x17d8   :  { %v1332_v34 = vpop.permute.xlu0 %1331 }
0x17d9   :  { %v1337_v36 = vmul.f32 %v1332_v34, %v1327_v33 }
0x17da   :  { %v1334_v39 = vpop.permute.xlu1 %1333 }
0x17db   :  { %v3926_v41 = vadd.f32 %v1337_v36, %v1325_v35  ;;  %v1338_v47 = vmul.f32 %v1334_v39, %v1328_v38  ;;  %v3982_v35 = vld [vmem:[%s4428_s0] sm:$0xff]  }
0x17dc   :  { %v1411_v49 = vpop.permute.xlu0 %1410 }
0x17dd   :  { %v3930_v48 = vadd.f32 %v1338_v47, %v1326_v42  ;;  %v1341_v52 = vmax.f32 %v3926_v41, 0.0 }
0x17df   :  { %v1401_v50 = vpack.c.bf16 %v3930_v48, %v3926_v41  ;;  %v1342_v54 = vmax.f32 %v3930_v48, 0.0 }
0x17e1   :  { %v1414_v55 = vsel %vm80_vm1, %v1401_v50, %v1411_v49  ;;  %1462 = vrot.lane.b32.xlu0 %v1401_v50, %s3438_s15  ;;  %v1343_v56 = vpack.c.bf16 %v1342_v54, %v1341_v52  ;;  %v4018_v49 = vld [vmem:[%s4431_s3 + $0x10] sm:$0xff]   ;;  %v4025_v50 = vld [vmem:[%s4431_s3 + $0x18] sm:$0xff]  }
0x17e3   :  { %3086 = vmatmul.mubr.msk.bf16.vlgmr.msra.gmra.mrb[32].mxu1 %vm80_vm1, %v1343_v56 }
0x17e4   :  { %3090 = vmatpush3.bf16.msra.mxu1 %v1414_v55  ;;  %3091 = vmatprep.mubr.msk.bf16.mxu1 %vm3437_vm0, %v3436_v1 }
0x17e5   :  { %3109 = vmatprep.subr.bf16.mxu1 %v3436_v1 }
0x17eb   :  { %3092 = vmatmul.mubr.msk.bf16.vlgmr.msra.gmra.mrb[36].mxu1 %vm90_vm2, %v3516_v7 }
0x17ec   :  { %3111 = vmatprep.mubr.msk.bf16.mxu1 %vm3437_vm0, %v3436_v1 }
0x1853   :  { %v1463_v16 = vpop.permute.xlu0 %1462 }
0x18b6   :  { %v3946_v57 = vpop.f32.mrb[32].mxu1 }
0x18b7   :  { %v3087_v58 = vpop.f32.mrb[33].mxu1 }
0x18b8   :  { %v3948_v59 = vpop.f32.mrb[34].mxu1 }
0x18b9   :  { %v3088_v60 = vpop.f32.mrb[35].mxu1 }
0x18be   :  { %v1450_v62 = vpop.f32.mrb[36].mxu1 }
0x18bf   :  { %v3093_v0 = vpop.f32.mrb[37].mxu1 }
0x18c0   :  { %v1453_v4 = vpop.f32.mrb[38].mxu1 }
0x18c1   :  { %v1457_v5 = vpack.c.bf16 %v1453_v4, %v1450_v62  ;;  %v3094_v12 = vpop.f32.mrb[39].mxu1 }
0x18c3   :  { %1459 = vrot.lane.b32.xlu1 %v1457_v5, %s3439_s24  ;;  %v3300_v5 = vld [vmem:[%s4429_s1 + $0x28] sm:$0xff]  }
0x1935   :  { %v1460_v14 = vpop.permute.xlu1 %1459 }
0x1936   :  { %v1466_v7 = vsel %vm142_vm4, %v3299_v31, %v1460_v14 }
0x1937   :  { %v1468_v17 = vsel %vm146_vm5, %v1466_v7, %v1463_v16 }
0x1938   :  { %3106 = vmatmul.mubr.msk.bf16.vlgmr.msra.gmra.mrb[44].mxu0 %vm176_vm6, %v1468_v17 }
0x1939   :  { %3128 = vmatpush3.bf16.msra.mxu0 %v3625_v61  ;;  %3131 = vmatprep.mubr.msk.bf16.mxu0 %vm3437_vm0, %v3436_v1 }
0x193a   :  { %3129 = vmatprep.subr.bf16.mxu0 %v3436_v1 }
0x193d   :  { %3130 = vmatpush3.bf16.msra.mxu0 %v3632_v63 }
0x193e   :  { %3135 = vmatprep.subr.bf16.mxu0 %v3436_v1 }
0x1a0b   :  { %v1505_v19 = vpop.f32.mrb[44].mxu0 }
0x1a0c   :  { %v3961_v20 = vadd.f32 %v3568_v23, %v1505_v19  ;;  %v3107_v22 = vpop.f32.mrb[45].mxu0 }
0x1a0d   :  { %v1508_v8 = vpop.f32.mrb[46].mxu0 }
0x1a0e   :  { %v2726_v24 = vmul.f32 -1.442695, %v3961_v20  ;;  %v3965_v2 = vadd.f32 %v3568_v23, %v1508_v8  ;;  %v3108_v61 = vpop.f32.mrb[47].mxu0 }
0x1a10   :  { %3351 = vpow2.f32 %v2726_v24  ;;  %v2727_v9 = vmul.f32 -1.442695, %v3965_v2 }
0x1a12   :  { %3353 = vpow2.f32 %v2727_v9 }
0x1a1a   :  { %v3352_v27 = vpop.eup %3351 }
0x1a1b   :  { %v1518_v63 = vadd.f32 1.0, %v3352_v27 }
0x1a1c   :  { %v3354_v10 = vpop.eup %3353 }
0x1a1d   :  { %3355 = vrcp.f32 %v1518_v63  ;;  %v1519_v28 = vadd.f32 1.0, %v3354_v10 }
0x1a1f   :  { %3357 = vrcp.f32 %v1519_v28 }
0x1a27   :  { %v3968_v11 = vpop.eup %3355 }
0x1a28   :  { %1526 = vrot.lane.b32.xlu1 %v3968_v11, %s3440_s27  ;;  %v1640_v14 = vsub.f32 1.0, %v3968_v11  ;;  %v1638_v7 = vmul.f32 %v3968_v11, %v3926_v41 }
0x1a29   :  { %v3972_v30 = vpop.eup %3357 }
0x1a2a   :  { %1528 = vrot.lane.b32.xlu0 %v3972_v30, %s3440_s27  ;;  %v1641_v19 = vsub.f32 1.0, %v3972_v30  ;;  %v1639_v8 = vmul.f32 %v3972_v30, %v3930_v48 }
0x1a9a   :  { %v1527_v23 = vpop.permute.xlu1 %1526 }
0x1a9b   :  { %v1532_v32 = vmul.f32 %v1527_v23, %v3926_v41 }
0x1a9c   :  { %v1529_v31 = vpop.permute.xlu0 %1528 }
0x1a9d   :  { %v1533_v33 = vmul.f32 %v1529_v31, %v3930_v48 }
0x1a9f   :  { %v1534_v34 = vpack.c.bf16 %v1533_v33, %v1532_v32 }
0x1aa1   :  { %3110 = vmatpush3.bf16.msra.mxu1 %v1534_v34 }
0x1aa2   :  { %3115 = vmatprep.subr.bf16.mxu1 %v3436_v1 }
0x1aa4   :  { %3112 = vmatmul.mubr.msk.bf16.vlgmr.msra.gmra.mrb[40].mxu1 %vm90_vm2, %v3982_v35 }
0x1aa5   :  { %3116 = vmatpush3.bf16.msra.mxu1 %v3590_v43  ;;  %3123 = vmatprep.mubr.msk.bf16.mxu1 %vm3437_vm0, %v3436_v1 }
0x1aa6   :  { %3117 = vmatprep.subr.bf16.mxu1 %v3436_v1 }
0x1aa9   :  { %3118 = vmatpush3.bf16.msra.mxu1 %v3596_v44 }
0x1aaa   :  { %3119 = vmatprep.subr.bf16.mxu1 %v3436_v1 }
0x1aad   :  { %3120 = vmatpush3.bf16.msra.mxu1 %v3603_v45  ;;  %v4002_v45 = vld [vmem:[%s4431_s3] sm:$0xff]  }
0x1aae   :  { %3121 = vmatprep.subr.bf16.mxu1 %v3436_v1 }
0x1ab1   :  { %3122 = vmatpush3.bf16.msra.mxu1 %v3610_v46  ;;  %v4011_v46 = vld [vmem:[%s4431_s3 + $0x8] sm:$0xff]  }
0x1ab2   :  { %3141 = vmatprep.subr.bf16.mxu1 %v3436_v1 }
0x1b77   :  { %v1569_v36 = vpop.f32.mrb[40].mxu1 }
0x1b78   :  { %v3113_v38 = vpop.f32.mrb[41].mxu1 }
0x1b79   :  { %v1572_v43 = vpop.f32.mrb[42].mxu1 }
0x1b7a   :  { %v1576_v39 = vpack.c.bf16 %v1572_v43, %v1569_v36  ;;  %v3114_v42 = vpop.f32.mrb[43].mxu1 }
0x1b7c   :  { %1578 = vrot.lane.b32.xlu1 %v1576_v39, %s3435_s29 }
0x1bee   :  { %v1579_v47 = vpop.permute.xlu1 %1578 }
0x1bef   :  { %v1582_v44 = vsel %vm80_vm1, %v1534_v34, %v1579_v47 }
0x1bf0   :  { %3124 = vmatmul.mubr.msk.bf16.vlgmr.msra.gmra.mrb[44].mxu1 %vm319_vm7, %v1582_v44  ;;  %v4076_v44 = vld [vmem:[%s4434_s6] sm:$0xff]  }
0x1bf1   :  { %3142 = vmatpush3.bf16.msra.mxu1 %v4002_v45  ;;  %3151 = vmatprep.mubr.msk.bf16.mxu1 %vm3437_vm0, %v3436_v1 }
0x1bf2   :  { %3143 = vmatprep.subr.bf16.mxu1 %v3436_v1 }
0x1bf5   :  { %3144 = vmatpush3.bf16.msra.mxu1 %v4011_v46 }
0x1bf6   :  { %3145 = vmatprep.subr.bf16.mxu1 %v3436_v1 }
0x1bf9   :  { %3146 = vmatpush3.bf16.msra.mxu1 %v4018_v49 }
0x1bfa   :  { %3147 = vmatprep.subr.bf16.mxu1 %v3436_v1 }
0x1bfd   :  { %3148 = vmatpush3.bf16.msra.mxu1 %v4025_v50 }
0x1bfe   :  { %3149 = vmatprep.subr.bf16.mxu1 %v3436_v1 }
0x1c01   :  { %3150 = vmatpush3.bf16.msra.mxu1 %v3555_v13 }
0x1c02   :  { %3173 = vmatprep.subr.bf16.mxu1 %v3436_v1 }
0x1cc3   :  { %v1619_v52 = vpop.f32.mrb[44].mxu1 }
0x1cc4   :  { %1628 = vrot.lane.b32.xlu0 %v1619_v52, %s3441_s14  ;;  %v3125_v54 = vpop.f32.mrb[45].mxu1  ;;  %v4085_v52 = vld [vmem:[%s4434_s6 + $0x8] sm:$0xff]  }
0x1cc5   :  { %v1622_v55 = vpop.f32.mrb[46].mxu1 }
0x1cc6   :  { %1630 = vrot.lane.b32.xlu1 %v1622_v55, %s3441_s14  ;;  %v3126_v56 = vpop.f32.mrb[47].mxu1  ;;  %v4092_v55 = vld [vmem:[%s4432_s4] ss:$0 sm:$0xff] }
0x1d36   :  { %v1629_v58 = vpop.permute.xlu0 %1628 }
0x1d37   :  { %v1634_v60 = vadd.f32 %v1629_v58, %v3961_v20 }
0x1d38   :  { %v1631_v62 = vpop.permute.xlu1 %1630 }
0x1d39   :  { %3359 = vtanh.f32 %v1634_v60  ;;  %v1635_v0 = vadd.f32 %v1631_v62, %v3965_v2 }
0x1d3b   :  { %3361 = vtanh.f32 %v1635_v0 }
0x1d43   :  { %v3360_v4 = vpop.eup %3359 }
0x1d44   :  { %1644 = vrot.lane.b32.xlu0 %v3360_v4, %s3441_s14 }
0x1d45   :  { %v3362_v12 = vpop.eup %3361 }
0x1d46   :  { %1646 = vrot.lane.b32.xlu1 %v3362_v12, %s3441_s14 }
0x1d48   :  { %1723 = vrot.lane.b32.xlu0 %v3300_v5, %s3435_s29 }
0x1db6   :  { %v1645_v16 = vpop.permute.xlu0 %1644 }
0x1db7   :  { %v1650_v17 = vmul.f32 %v1645_v16, %v1640_v14 }
0x1db8   :  { %v1647_v20 = vpop.permute.xlu1 %1646 }
0x1db9   :  { %v4045_v22 = vadd.f32 %v1650_v17, %v1638_v7  ;;  %v1651_v24 = vmul.f32 %v1647_v20, %v1641_v19 }
0x1dba   :  { %v1724_v61 = vpop.permute.xlu0 %1723 }
0x1dbb   :  { %v4049_v2 = vadd.f32 %v1651_v24, %v1639_v8  ;;  %v1654_v27 = vmax.f32 %v4045_v22, 0.0 }
0x1dbd   :  { %v1714_v9 = vpack.c.bf16 %v4049_v2, %v4045_v22  ;;  %v1655_v63 = vmax.f32 %v4049_v2, 0.0 }
0x1dbf   :  { %v1727_v10 = vsel %vm80_vm1, %v1714_v9, %v1724_v61  ;;  %1775 = vrot.lane.b32.xlu0 %v1714_v9, %s3438_s15  ;;  %v1656_v28 = vpack.c.bf16 %v1655_v63, %v1654_v27  ;;  %v4118_v27 = vld [vmem:[%s4433_s5] sm:$0xff]   ;;  %v4127_v63 = vld [vmem:[%s4433_s5 + $0x8] sm:$0xff]  }
0x1dc1   :  { %3132 = vmatmul.mubr.msk.bf16.vlgmr.msra.gmra.mrb[48].mxu0 %vm80_vm1, %v1656_v28  ;;  %v4141_v28 = vld [vmem:[%s4433_s5 + $0x18] sm:$0xff]  }
0x1dc2   :  { %3136 = vmatpush3.bf16.msra.mxu0 %v1727_v10  ;;  %3137 = vmatprep.mubr.msk.bf16.mxu0 %vm3437_vm0, %v3436_v1  ;;  %v4134_v10 = vld [vmem:[%s4433_s5 + $0x10] sm:$0xff]  }
0x1dc3   :  { %3155 = vmatprep.subr.bf16.mxu0 %v3436_v1 }
0x1dc9   :  { %3138 = vmatmul.mubr.msk.bf16.vlgmr.msra.gmra.mrb[52].mxu0 %vm90_vm2, %v3982_v35 }
0x1dca   :  { %3157 = vmatprep.mubr.msk.bf16.mxu0 %vm3437_vm0, %v3436_v1 }
0x1e31   :  { %v1776_v39 = vpop.permute.xlu0 %1775 }
0x1e94   :  { %v4065_v11 = vpop.f32.mrb[48].mxu0 }
0x1e95   :  { %v3133_v30 = vpop.f32.mrb[49].mxu0 }
0x1e96   :  { %v4067_v23 = vpop.f32.mrb[50].mxu0 }
0x1e97   :  { %v3134_v31 = vpop.f32.mrb[51].mxu0 }
0x1e9c   :  { %v1763_v32 = vpop.f32.mrb[52].mxu0 }
0x1e9d   :  { %v3139_v33 = vpop.f32.mrb[53].mxu0 }
0x1e9e   :  { %v1766_v34 = vpop.f32.mrb[54].mxu0 }
0x1e9f   :  { %v1770_v36 = vpack.c.bf16 %v1766_v34, %v1763_v32  ;;  %v3140_v38 = vpop.f32.mrb[55].mxu0 }
0x1ea1   :  { %1772 = vrot.lane.b32.xlu1 %v1770_v36, %s3439_s24 }
0x1f13   :  { %v1773_v43 = vpop.permute.xlu1 %1772 }
0x1f14   :  { %v1779_v42 = vsel %vm142_vm4, %v3300_v5, %v1773_v43 }
0x1f15   :  { %v1781_v47 = vsel %vm146_vm5, %v1779_v42, %v1776_v39 }
0x1f16   :  { %3152 = vmatmul.mubr.msk.bf16.vlgmr.msra.gmra.mrb[48].mxu1 %vm176_vm6, %v1781_v47 }
0x1f17   :  { %3174 = vmatpush3.bf16.msra.mxu1 %v4076_v44  ;;  %3177 = vmatprep.mubr.msk.bf16.mxu1 %vm3437_vm0, %v3436_v1 }
0x1f18   :  { %3175 = vmatprep.subr.bf16.mxu1 %v3436_v1 }
0x1f1b   :  { %3176 = vmatpush3.bf16.msra.mxu1 %v4085_v52 }
0x1f1c   :  { %3181 = vmatprep.subr.bf16.mxu1 %v3436_v1 }
0x1fe9   :  { %v1818_v54 = vpop.f32.mrb[48].mxu1 }
0x1fea   :  { %v4095_v56 = vadd.f32 %v4092_v55, %v1818_v54  ;;  %v3153_v58 = vpop.f32.mrb[49].mxu1 }
0x1feb   :  { %v1821_v60 = vpop.f32.mrb[50].mxu1 }
0x1fec   :  { %v2736_v62 = vmul.f32 -1.442695, %v4095_v56  ;;  %v4099_v0 = vadd.f32 %v4092_v55, %v1821_v60  ;;  %v3154_v4 = vpop.f32.mrb[51].mxu1 }
0x1fee   :  { %3363 = vpow2.f32 %v2736_v62  ;;  %v2737_v5 = vmul.f32 -1.442695, %v4099_v0 }
0x1ff0   :  { %3365 = vpow2.f32 %v2737_v5  ;;  %v3301_v5 = vld [vmem:[%s4429_s1 + $0x30] sm:$0xff]  }
0x1ff8   :  { %v3364_v12 = vpop.eup %3363 }
0x1ff9   :  { %v1831_v14 = vadd.f32 1.0, %v3364_v12 }
0x1ffa   :  { %v3366_v16 = vpop.eup %3365 }
0x1ffb   :  { %3367 = vrcp.f32 %v1831_v14  ;;  %v1832_v7 = vadd.f32 1.0, %v3366_v16 }
0x1ffd   :  { %3369 = vrcp.f32 %v1832_v7 }
0x2005   :  { %v4102_v17 = vpop.eup %3367 }
0x2006   :  { %1839 = vrot.lane.b32.xlu1 %v4102_v17, %s3440_s27  ;;  %v1953_v14 = vsub.f32 1.0, %v4102_v17  ;;  %v1951_v16 = vmul.f32 %v4102_v17, %v4045_v22 }
0x2007   :  { %v4106_v19 = vpop.eup %3369 }
0x2008   :  { %1841 = vrot.lane.b32.xlu0 %v4106_v19, %s3440_s27  ;;  %v1954_v7 = vsub.f32 1.0, %v4106_v19 }
0x2078   :  { %v1840_v20 = vpop.permute.xlu1 %1839 }
0x2079   :  { %v1845_v24 = vmul.f32 %v1840_v20, %v4045_v22 }
0x207a   :  { %v1842_v8 = vpop.permute.xlu0 %1841 }
0x207b   :  { %v1846_v61 = vmul.f32 %v1842_v8, %v4049_v2 }
0x207d   :  { %v1847_v9 = vpack.c.bf16 %v1846_v61, %v1845_v24  ;;  %v1952_v24 = vmul.f32 %v4106_v19, %v4049_v2 }
0x207f   :  { %3156 = vmatpush3.bf16.msra.mxu0 %v1847_v9 }
0x2080   :  { %3161 = vmatprep.subr.bf16.mxu0 %v3436_v1 }
0x2082   :  { %3158 = vmatmul.mubr.msk.bf16.vlgmr.msra.gmra.mrb[56].mxu0 %vm90_vm2, %v3982_v35 }
0x2083   :  { %3162 = vmatpush3.bf16.msra.mxu0 %v4118_v27  ;;  %3169 = vmatprep.mubr.msk.bf16.mxu0 %vm3437_vm0, %v3436_v1 }
0x2084   :  { %3163 = vmatprep.subr.bf16.mxu0 %v3436_v1 }
0x2087   :  { %3164 = vmatpush3.bf16.msra.mxu0 %v4127_v63 }
0x2088   :  { %3165 = vmatprep.subr.bf16.mxu0 %v3436_v1 }
0x208b   :  { %3166 = vmatpush3.bf16.msra.mxu0 %v4134_v10 }
0x208c   :  { %3167 = vmatprep.subr.bf16.mxu0 %v3436_v1 }
0x208f   :  { %3168 = vmatpush3.bf16.msra.mxu0 %v4141_v28 }
0x2090   :  { %3187 = vmatprep.subr.bf16.mxu0 %v3436_v1 }
0x2155   :  { %v1882_v30 = vpop.f32.mrb[56].mxu0 }
0x2156   :  { %v3159_v31 = vpop.f32.mrb[57].mxu0 }
0x2157   :  { %v1885_v32 = vpop.f32.mrb[58].mxu0 }
0x2158   :  { %v1889_v33 = vpack.c.bf16 %v1885_v32, %v1882_v30  ;;  %v3160_v34 = vpop.f32.mrb[59].mxu0 }
0x215a   :  { %1891 = vrot.lane.b32.xlu1 %v1889_v33, %s3435_s29 }
0x21cc   :  { %v1892_v36 = vpop.permute.xlu1 %1891 }
0x21cd   :  { %v1895_v38 = vsel %vm80_vm1, %v1847_v9, %v1892_v36 }
0x21ce   :  { %3170 = vmatmul.mubr.msk.bf16.vlgmr.msra.gmra.mrb[60].mxu0 %vm319_vm7, %v1895_v38 }
0x21cf   :  { %3188 = vmatpush3.bf16.msra.mxu0 %v4002_v45  ;;  %3197 = vmatprep.mubr.msk.bf16.mxu0 %vm3437_vm0, %v3436_v1 }
0x21d0   :  { %3189 = vmatprep.subr.bf16.mxu0 %v3436_v1 }
0x21d3   :  { %3190 = vmatpush3.bf16.msra.mxu0 %v4011_v46 }
0x21d4   :  { %3191 = vmatprep.subr.bf16.mxu0 %v3436_v1 }
0x21d7   :  { %3192 = vmatpush3.bf16.msra.mxu0 %v4018_v49 }
0x21d8   :  { %3193 = vmatprep.subr.bf16.mxu0 %v3436_v1 }
0x21db   :  { %3194 = vmatpush3.bf16.msra.mxu0 %v4025_v50 }
0x21dc   :  { %3195 = vmatprep.subr.bf16.mxu0 %v3436_v1 }
0x21df   :  { %3196 = vmatpush3.bf16.msra.mxu0 %v3555_v13 }
0x21e0   :  { %3219 = vmatprep.subr.bf16.mxu0 %v3436_v1 }
0x22a1   :  { %v1932_v43 = vpop.f32.mrb[60].mxu0 }
0x22a2   :  { %1941 = vrot.lane.b32.xlu0 %v1932_v43, %s3441_s14  ;;  %v3171_v39 = vpop.f32.mrb[61].mxu0 }
0x22a3   :  { %v1935_v42 = vpop.f32.mrb[62].mxu0 }
0x22a4   :  { %1943 = vrot.lane.b32.xlu1 %v1935_v42, %s3441_s14  ;;  %v3172_v47 = vpop.f32.mrb[63].mxu0 }
0x2314   :  { %v1942_v54 = vpop.permute.xlu0 %1941 }
0x2315   :  { %v1947_v58 = vadd.f32 %v1942_v54, %v4095_v56 }
0x2316   :  { %v1944_v60 = vpop.permute.xlu1 %1943 }
0x2317   :  { %3371 = vtanh.f32 %v1947_v58  ;;  %v1948_v62 = vadd.f32 %v1944_v60, %v4099_v0 }
0x2319   :  { %3373 = vtanh.f32 %v1948_v62 }
0x2321   :  { %v3372_v4 = vpop.eup %3371 }
0x2322   :  { %1957 = vrot.lane.b32.xlu0 %v3372_v4, %s3441_s14 }
0x2323   :  { %v3374_v12 = vpop.eup %3373 }
0x2324   :  { %1959 = vrot.lane.b32.xlu1 %v3374_v12, %s3441_s14 }
0x2326   :  { %2036 = vrot.lane.b32.xlu0 %v3301_v5, %s3435_s29 }
0x2394   :  { %v1958_v56 = vpop.permute.xlu0 %1957 }
0x2395   :  { %v1963_v0 = vmul.f32 %v1958_v56, %v1953_v14 }
0x2396   :  { %v1960_v20 = vpop.permute.xlu1 %1959 }
0x2397   :  { %v4174_v8 = vadd.f32 %v1963_v0, %v1951_v16  ;;  %v1964_v61 = vmul.f32 %v1960_v20, %v1954_v7 }
0x2398   :  { %v2037_v30 = vpop.permute.xlu0 %2036 }
0x2399   :  { %v4178_v9 = vadd.f32 %v1964_v61, %v1952_v24  ;;  %v1967_v32 = vmax.f32 %v4174_v8, 0.0 }
0x239b   :  { %v2027_v31 = vpack.c.bf16 %v4178_v9, %v4174_v8  ;;  %v1968_v17 = vmax.f32 %v4178_v9, 0.0 }
0x239d   :  { %v2040_v33 = vsel %vm80_vm1, %v2027_v31, %v2037_v30  ;;  %2088 = vrot.lane.b32.xlu0 %v2027_v31, %s3438_s15  ;;  %v1969_v34 = vpack.c.bf16 %v1968_v17, %v1967_v32 }
0x239f   :  { %3178 = vmatmul.mubr.msk.bf16.vlgmr.msra.gmra.mrb[52].mxu1 %vm80_vm1, %v1969_v34 }
0x23a0   :  { %3182 = vmatpush3.bf16.msra.mxu1 %v2040_v33  ;;  %3183 = vmatprep.mubr.msk.bf16.mxu1 %vm3437_vm0, %v3436_v1 }
0x23a1   :  { %3201 = vmatprep.subr.bf16.mxu1 %v3436_v1 }
0x23a7   :  { %3184 = vmatmul.mubr.msk.bf16.vlgmr.msra.gmra.mrb[56].mxu1 %vm90_vm2, %v3982_v35 }
0x23a8   :  { %3203 = vmatprep.mubr.msk.bf16.mxu1 %vm3437_vm0, %v3436_v1 }
0x240f   :  { %v2089_v62 = vpop.permute.xlu0 %2088 }
0x2472   :  { %v4194_v19 = vpop.f32.mrb[52].mxu1 }
0x2473   :  { %v3179_v36 = vpop.f32.mrb[53].mxu1 }
0x2474   :  { %v4196_v38 = vpop.f32.mrb[54].mxu1 }
0x2475   :  { %v3180_v43 = vpop.f32.mrb[55].mxu1 }
0x247a   :  { %v2076_v39 = vpop.f32.mrb[56].mxu1 }
0x247b   :  { %v3185_v42 = vpop.f32.mrb[57].mxu1 }
0x247c   :  { %v2079_v47 = vpop.f32.mrb[58].mxu1 }
0x247d   :  { %v2083_v54 = vpack.c.bf16 %v2079_v47, %v2076_v39  ;;  %v3186_v58 = vpop.f32.mrb[59].mxu1 }
0x247f   :  { %2085 = vrot.lane.b32.xlu1 %v2083_v54, %s3439_s24 }
0x24f1   :  { %v2086_v60 = vpop.permute.xlu1 %2085 }
0x24f2   :  { %v2092_v4 = vsel %vm142_vm4, %v3301_v5, %v2086_v60 }
0x24f3   :  { %v2094_v12 = vsel %vm146_vm5, %v2092_v4, %v2089_v62 }
0x24f4   :  { %3198 = vmatmul.mubr.msk.bf16.vlgmr.msra.gmra.mrb[64].mxu0 %vm176_vm6, %v2094_v12 }
0x24f5   :  { %3220 = vmatpush3.bf16.msra.mxu0 %v4076_v44  ;;  %3223 = vmatprep.mubr.msk.bf16.mxu0 %vm3437_vm0, %v3436_v1 }
0x24f6   :  { %3221 = vmatprep.subr.bf16.mxu0 %v3436_v1 }
0x24f9   :  { %3222 = vmatpush3.bf16.msra.mxu0 %v4085_v52 }
0x24fa   :  { %3227 = vmatprep.subr.bf16.mxu0 %v3436_v1 }
0x25c7   :  { %v2131_v14 = vpop.f32.mrb[64].mxu0 }
0x25c8   :  { %v4209_v56 = vadd.f32 %v4092_v55, %v2131_v14  ;;  %v3199_v5 = vpop.f32.mrb[65].mxu0 }
0x25c9   :  { %v2134_v16 = vpop.f32.mrb[66].mxu0 }
0x25ca   :  { %v2746_v0 = vmul.f32 -1.442695, %v4209_v56  ;;  %v2135_v7 = vadd.f32 %v4092_v55, %v2134_v16  ;;  %v3200_v20 = vpop.f32.mrb[67].mxu0 }
0x25cc   :  { %3375 = vpow2.f32 %v2746_v0  ;;  %v2747_v24 = vmul.f32 -1.442695, %v2135_v7 }
0x25ce   :  { %3377 = vpow2.f32 %v2747_v24 }
0x25d6   :  { %v3376_v61 = vpop.eup %3375 }
0x25d7   :  { %v2144_v30 = vadd.f32 1.0, %v3376_v61 }
0x25d8   :  { %v3378_v31 = vpop.eup %3377 }
0x25d9   :  { %3379 = vrcp.f32 %v2144_v30  ;;  %v2145_v32 = vadd.f32 1.0, %v3378_v31 }
0x25db   :  { %3381 = vrcp.f32 %v2145_v32 }
0x25e3   :  { %v4213_v17 = vpop.eup %3379 }
0x25e4   :  { %2152 = vrot.lane.b32.xlu1 %v4213_v17, %s3440_s27  ;;  %v2266_v61 = vsub.f32 1.0, %v4213_v17 }
0x25e5   :  { %v4217_v33 = vpop.eup %3381 }
0x25e6   :  { %2154 = vrot.lane.b32.xlu0 %v4217_v33, %s3440_s27  ;;  %v2267_v31 = vsub.f32 1.0, %v4217_v33 }
0x2656   :  { %v2153_v34 = vpop.permute.xlu1 %2152 }
0x2657   :  { %v2158_v43 = vmul.f32 %v2153_v34, %v4174_v8 }
0x2658   :  { %v2155_v36 = vpop.permute.xlu0 %2154 }
0x2659   :  { %v2159_v39 = vmul.f32 %v2155_v36, %v4178_v9  ;;  %v2265_v36 = vmul.f32 %v4217_v33, %v4178_v9 }
0x265b   :  { %v2160_v42 = vpack.c.bf16 %v2159_v39, %v2158_v43 }
0x265d   :  { %3202 = vmatpush3.bf16.msra.mxu1 %v2160_v42 }
0x265e   :  { %3207 = vmatprep.subr.bf16.mxu1 %v3436_v1 }
0x2660   :  { %3204 = vmatmul.mubr.msk.bf16.vlgmr.msra.gmra.mrb[60].mxu1 %vm90_vm2, %v3982_v35 }
0x2661   :  { %3208 = vmatpush3.bf16.msra.mxu1 %v4118_v27  ;;  %3215 = vmatprep.mubr.msk.bf16.mxu1 %vm3437_vm0, %v3436_v1 }
0x2662   :  { %3209 = vmatprep.subr.bf16.mxu1 %v3436_v1 }
0x2665   :  { %3210 = vmatpush3.bf16.msra.mxu1 %v4127_v63 }
0x2666   :  { %3211 = vmatprep.subr.bf16.mxu1 %v3436_v1 }
0x2669   :  { %3212 = vmatpush3.bf16.msra.mxu1 %v4134_v10 }
0x266a   :  { %3213 = vmatprep.subr.bf16.mxu1 %v3436_v1 }
0x266d   :  { %3214 = vmatpush3.bf16.msra.mxu1 %v4141_v28 }
0x266e   :  { %3233 = vmatprep.subr.bf16.mxu1 %v3436_v1 }
0x2733   :  { %v2195_v47 = vpop.f32.mrb[60].mxu1 }
0x2734   :  { %v3205_v54 = vpop.f32.mrb[61].mxu1 }
0x2735   :  { %v2198_v58 = vpop.f32.mrb[62].mxu1 }
0x2736   :  { %v2202_v60 = vpack.c.bf16 %v2198_v58, %v2195_v47  ;;  %v3206_v62 = vpop.f32.mrb[63].mxu1 }
0x2738   :  { %2204 = vrot.lane.b32.xlu1 %v2202_v60, %s3435_s29 }
0x27aa   :  { %v2205_v4 = vpop.permute.xlu1 %2204 }
0x27ab   :  { %v2208_v12 = vsel %vm80_vm1, %v2160_v42, %v2205_v4 }
0x27ac   :  { %3216 = vmatmul.mubr.msk.bf16.vlgmr.msra.gmra.mrb[64].mxu1 %vm319_vm7, %v2208_v12 }
0x27ad   :  { %3234 = vmatpush3.bf16.msra.mxu1 %v4002_v45  ;;  %3243 = vmatprep.mubr.msk.bf16.mxu1 %vm3437_vm0, %v3436_v1 }
0x27ae   :  { %3235 = vmatprep.subr.bf16.mxu1 %v3436_v1 }
0x27b1   :  { %3236 = vmatpush3.bf16.msra.mxu1 %v4011_v46 }
0x27b2   :  { %3237 = vmatprep.subr.bf16.mxu1 %v3436_v1 }
0x27b5   :  { %3238 = vmatpush3.bf16.msra.mxu1 %v4018_v49 }
0x27b6   :  { %3239 = vmatprep.subr.bf16.mxu1 %v3436_v1 }
0x27b9   :  { %3240 = vmatpush3.bf16.msra.mxu1 %v4025_v50 }
0x27ba   :  { %3241 = vmatprep.subr.bf16.mxu1 %v3436_v1 }
0x27bd   :  { %3242 = vmatpush3.bf16.msra.mxu1 %v3555_v13  ;;  %v3302_v13 = vld [vmem:[%s4429_s1 + $0x38] sm:$0xff]  }
0x27be   :  { %3265 = vmatprep.subr.bf16.mxu1 %v3436_v1 }
0x287f   :  { %v2245_v45 = vpop.f32.mrb[64].mxu1 }
0x2880   :  { %2254 = vrot.lane.b32.xlu0 %v2245_v45, %s3441_s14  ;;  %v3217_v14 = vpop.f32.mrb[65].mxu1 }
0x2881   :  { %v2248_v5 = vpop.f32.mrb[66].mxu1 }
0x2882   :  { %2256 = vrot.lane.b32.xlu1 %v2248_v5, %s3441_s14  ;;  %v3218_v46 = vpop.f32.mrb[67].mxu1 }
0x28f2   :  { %v2255_v16 = vpop.permute.xlu0 %2254 }
0x28f3   :  { %v2260_v49 = vadd.f32 %v2255_v16, %v4209_v56  ;;  %v2264_v56 = vmul.f32 %v4213_v17, %v4174_v8 }
0x28f4   :  { %v2257_v0 = vpop.permute.xlu1 %2256 }
0x28f5   :  { %3383 = vtanh.f32 %v2260_v49  ;;  %v2261_v50 = vadd.f32 %v2257_v0, %v2135_v7 }
0x28f7   :  { %3385 = vtanh.f32 %v2261_v50 }
0x28ff   :  { %v3384_v20 = vpop.eup %3383 }
0x2900   :  { %2270 = vrot.lane.b32.xlu0 %v3384_v20, %s3441_s14 }
0x2901   :  { %v3386_v24 = vpop.eup %3385 }
0x2902   :  { %2272 = vrot.lane.b32.xlu1 %v3386_v24, %s3441_s14 }
0x2904   :  { %2349 = vrot.lane.b32.xlu0 %v3302_v13, %s3435_s29 }
0x2972   :  { %v2271_v30 = vpop.permute.xlu0 %2270 }
0x2973   :  { %v2276_v7 = vmul.f32 %v2271_v30, %v2266_v61 }
0x2974   :  { %v2273_v32 = vpop.permute.xlu1 %2272 }
0x2975   :  { %v4264_v34 = vadd.f32 %v2276_v7, %v2264_v56  ;;  %v2277_v43 = vmul.f32 %v2273_v32, %v2267_v31 }
0x2976   :  { %v2350_v42 = vpop.permute.xlu0 %2349 }
0x2977   :  { %v4268_v39 = vadd.f32 %v2277_v43, %v2265_v36  ;;  %v2280_v54 = vmax.f32 %v4264_v34, 0.0 }
0x2979   :  { %v2340_v47 = vpack.c.bf16 %v4268_v39, %v4264_v34  ;;  %v2281_v17 = vmax.f32 %v4268_v39, 0.0 }
0x297b   :  { %v2353_v58 = vsel %vm80_vm1, %v2340_v47, %v2350_v42  ;;  %2401 = vrot.lane.b32.xlu0 %v2340_v47, %s3438_s15  ;;  %v2282_v60 = vpack.c.bf16 %v2281_v17, %v2280_v54 }
0x297d   :  { %3224 = vmatmul.mubr.msk.bf16.vlgmr.msra.gmra.mrb[68].mxu0 %vm80_vm1, %v2282_v60 }
0x297e   :  { %3228 = vmatpush3.bf16.msra.mxu0 %v2353_v58  ;;  %3229 = vmatprep.mubr.msk.bf16.mxu0 %vm3437_vm0, %v3436_v1 }
0x297f   :  { %3247 = vmatprep.subr.bf16.mxu0 %v3436_v1 }
0x2985   :  { %3230 = vmatmul.mubr.msk.bf16.vlgmr.msra.gmra.mrb[72].mxu0 %vm90_vm2, %v3982_v35 }
0x2986   :  { %3249 = vmatprep.mubr.msk.bf16.mxu0 %vm3437_vm0, %v3436_v1 }
0x29ed   :  { %v2402_v0 = vpop.permute.xlu0 %2401 }
0x2a50   :  { %v4284_v33 = vpop.f32.mrb[68].mxu0 }
0x2a51   :  { %v3225_v62 = vpop.f32.mrb[69].mxu0 }
0x2a52   :  { %v4286_v4 = vpop.f32.mrb[70].mxu0 }
0x2a53   :  { %v3226_v12 = vpop.f32.mrb[71].mxu0 }
0x2a58   :  { %v2389_v45 = vpop.f32.mrb[72].mxu0 }
0x2a59   :  { %v3231_v14 = vpop.f32.mrb[73].mxu0 }
0x2a5a   :  { %v2392_v5 = vpop.f32.mrb[74].mxu0 }
0x2a5b   :  { %v2396_v46 = vpack.c.bf16 %v2392_v5, %v2389_v45  ;;  %v3232_v16 = vpop.f32.mrb[75].mxu0 }
0x2a5d   :  { %2398 = vrot.lane.b32.xlu1 %v2396_v46, %s3439_s24 }
0x2acf   :  { %v2399_v49 = vpop.permute.xlu1 %2398 }
0x2ad0   :  { %v2405_v50 = vsel %vm142_vm4, %v3302_v13, %v2399_v49 }
0x2ad1   :  { %v2407_v20 = vsel %vm146_vm5, %v2405_v50, %v2402_v0 }
0x2ad2   :  { %3244 = vmatmul.mubr.msk.bf16.vlgmr.msra.gmra.mrb[68].mxu1 %vm176_vm6, %v2407_v20  ;;  %v4329_v20 = vld [vmem:[%s4435_s7] ss:$0 sm:$0xff]  ;;  %s3442_s7 = smov [#allocation2]  }
0x2ad3   :  { %3266 = vmatpush3.bf16.msra.mxu1 %v4076_v44  ;;  %3269 = vmatprep.mubr.msk.bf16.mxu1 %vm3437_vm0, %v3436_v1  ;;  %s2658_s24 = sshll.u32 %s3442_s7, 4  ;;  %s2659_s24 = int_to_ptr.vmem [resolvable:$true] %s2658_s24 }
0x2ad4   :  { %3267 = vmatprep.subr.bf16.mxu1 %v3436_v1  ;;  %p3416_p1 = scmp.lt.s32.totalorder %s2659_s24, %s2659_s24 }
0x2ad7   :  { %3268 = vmatpush3.bf16.msra.mxu1 %v4085_v52 }
0x2ba5   :  { %v2444_v24 = vpop.f32.mrb[68].mxu1 }
0x2ba6   :  { %v2445_v61 = vadd.f32 %v4092_v55, %v2444_v24  ;;  %v3245_v30 = vpop.f32.mrb[69].mxu1 }
0x2ba7   :  { %v2447_v56 = vpop.f32.mrb[70].mxu1  ;;  %v444_v30 = vadd.f32 %v4329_v20, %v3676_v3  ;;  %v1069_v3 = vadd.f32 %v4329_v20, %v3856_v25  ;;  %v1695_v25 = vadd.f32 %v4329_v20, %v4065_v11  ;;  %v2321_v11 = vadd.f32 %v4329_v20, %v4284_v33 }
0x2ba8   :  { %v2756_v7 = vmul.f32 -1.442695, %v2445_v61  ;;  %v2448_v13 = vadd.f32 %v4092_v55, %v2447_v56  ;;  %v3246_v31 = vpop.f32.mrb[71].mxu1  ;;  %v756_v56 = vadd.f32 %v4329_v20, %v3766_v51  ;;  %v1382_v51 = vadd.f32 %v4329_v20, %v3946_v57 }
0x2ba9   :  { %v2008_v57 = vadd.f32 %v4329_v20, %v4194_v19 }
0x2baa   :  { %3387 = vpow2.f32 %v2756_v7  ;;  %v2757_v32 = vmul.f32 -1.442695, %v2448_v13  ;;  %v759_v7 = vadd.f32 %v4329_v20, %v3768_v53  ;;  %v1385_v53 = vadd.f32 %v4329_v20, %v3948_v59 }
0x2bab   :  { %v2011_v59 = vadd.f32 %v4329_v20, %v4196_v38 }
0x2bac   :  { %3389 = vpow2.f32 %v2757_v32 }
0x2bb4   :  { %v3388_v44 = vpop.eup %3387 }
0x2bb5   :  { %v2457_v36 = vadd.f32 1.0, %v3388_v44 }
0x2bb6   :  { %v3390_v43 = vpop.eup %3389 }
0x2bb7   :  { %3391 = vrcp.f32 %v2457_v36  ;;  %v2458_v42 = vadd.f32 1.0, %v3390_v43 }
0x2bb9   :  { %3393 = vrcp.f32 %v2458_v42 }
0x2bc1   :  { %v4299_v47 = vpop.eup %3391 }
0x2bc2   :  { %2465 = vrot.lane.b32.xlu1 %v4299_v47, %s3440_s27  ;;  %v2579_v19 = vsub.f32 1.0, %v4299_v47  ;;  %v2577_v38 = vmul.f32 %v4299_v47, %v4264_v34 }
0x2bc3   :  { %v4303_v52 = vpop.eup %3393 }
0x2bc4   :  { %2467 = vrot.lane.b32.xlu0 %v4303_v52, %s3440_s27  ;;  %v2580_v32 = vsub.f32 1.0, %v4303_v52  ;;  %v2578_v36 = vmul.f32 %v4303_v52, %v4268_v39  ;;  %s3411_s27 = scalar_lea.vmem %s2659_s24, 2048 }
0x2bc5   :  { %p3412_p0 = scmp.ne.s32.totalorder %s2659_s24, %s3411_s27  ;;  %p3417_p2 = scmp.lt.s32.totalorder %s3411_s27, %s3411_s27 }
0x2bc7   :  { %p3418_p3 = por %p3417_p2, %p3416_p1 }
0x2bc9   :  { %p3419_p4 = pnand %p3418_p3, %p3412_p0 }
0x2c34   :  { %v2466_v55 = vpop.permute.xlu1 %2465 }
0x2c35   :  { %v2471_v17 = vmul.f32 %v2466_v55, %v4264_v34 }
0x2c36   :  { %v2468_v54 = vpop.permute.xlu0 %2467 }
0x2c37   :  { %v2472_v58 = vmul.f32 %v2468_v54, %v4268_v39 }
0x2c39   :  { %v2473_v60 = vpack.c.bf16 %v2472_v58, %v2471_v17 }
0x2c3b   :  { %3248 = vmatpush3.bf16.msra.mxu0 %v2473_v60 }
0x2c3c   :  { %3253 = vmatprep.subr.bf16.mxu0 %v3436_v1 }
0x2c3e   :  { %3250 = vmatmul.mubr.msk.bf16.vlgmr.msra.gmra.mrb[76].mxu0 %vm90_vm2, %v3982_v35 }
0x2c3f   :  { %3254 = vmatpush3.bf16.msra.mxu0 %v4118_v27  ;;  %3261 = vmatprep.mubr.msk.bf16.mxu0 %vm3437_vm0, %v3436_v1 }
0x2c40   :  { %3255 = vmatprep.subr.bf16.mxu0 %v3436_v1 }
0x2c43   :  { %3256 = vmatpush3.bf16.msra.mxu0 %v4127_v63 }
0x2c44   :  { %3257 = vmatprep.subr.bf16.mxu0 %v3436_v1 }
0x2c47   :  { %3258 = vmatpush3.bf16.msra.mxu0 %v4134_v10 }
0x2c48   :  { %3259 = vmatprep.subr.bf16.mxu0 %v3436_v1 }
0x2c4b   :  { %3260 = vmatpush3.bf16.msra.mxu0 %v4141_v28 }
0x2d11   :  { %v2508_v62 = vpop.f32.mrb[76].mxu0 }
0x2d12   :  { %v3251_v12 = vpop.f32.mrb[77].mxu0 }
0x2d13   :  { %v2511_v35 = vpop.f32.mrb[78].mxu0 }
0x2d14   :  { %v2515_v45 = vpack.c.bf16 %v2511_v35, %v2508_v62  ;;  %v3252_v27 = vpop.f32.mrb[79].mxu0 }
0x2d16   :  { %2517 = vrot.lane.b32.xlu1 %v2515_v45, %s3435_s29 }
0x2d88   :  { %v2518_v14 = vpop.permute.xlu1 %2517 }
0x2d89   :  { %v2521_v5 = vsel %vm80_vm1, %v2473_v60, %v2518_v14 }
0x2d8a   :  { %3262 = vmatmul.mubr.msk.bf16.vlgmr.msra.gmra.mrb[80].mxu0 %vm319_vm7, %v2521_v5 }
0x2e5d   :  { %v2558_v63 = vpop.f32.mrb[80].mxu0 }
0x2e5e   :  { %2567 = vrot.lane.b32.xlu0 %v2558_v63, %s3441_s14  ;;  %v3263_v10 = vpop.f32.mrb[81].mxu0 }
0x2e5f   :  { %v2561_v46 = vpop.f32.mrb[82].mxu0 }
0x2e60   :  { %2569 = vrot.lane.b32.xlu1 %v2561_v46, %s3441_s14  ;;  %v3264_v1 = vpop.f32.mrb[83].mxu0 }
0x2ed0   :  { %v2568_v28 = vpop.permute.xlu0 %2567 }
0x2ed1   :  { %v2573_v16 = vadd.f32 %v2568_v28, %v2445_v61  ;;  %v447_v61 = vadd.f32 %v4329_v20, %v3678_v29  ;;  %v1072_v29 = vadd.f32 %v4329_v20, %v3858_v26  ;;  %v1698_v26 = vadd.f32 %v4329_v20, %v4067_v23 }
0x2ed2   :  { %v2570_v49 = vpop.permute.xlu1 %2569  ;;  %v2324_v23 = vadd.f32 %v4329_v20, %v4286_v4 }
0x2ed3   :  { %3395 = vtanh.f32 %v2573_v16  ;;  %v2574_v0 = vadd.f32 %v2570_v49, %v2448_v13 }
0x2ed5   :  { %3397 = vtanh.f32 %v2574_v0 }
0x2edd   :  { %v3396_v50 = vpop.eup %3395 }
0x2ede   :  { %2583 = vrot.lane.b32.xlu0 %v3396_v50, %s3441_s14 }
0x2edf   :  { %v3398_v24 = vpop.eup %3397 }
0x2ee0   :  { %2585 = vrot.lane.b32.xlu1 %v3398_v24, %s3441_s14 }
0x2ee2   :  { %452 = vrot.lane.b32.xlu0 %v444_v30, %s3435_s29 }
0x2ee4   :  { %454 = vrot.lane.b32.xlu1 %v447_v61, %s3435_s29 }
0x2ee6   :  { %764 = vrot.lane.b32.xlu0 %v756_v56, %s3435_s29 }
0x2ee8   :  { %766 = vrot.lane.b32.xlu1 %v759_v7, %s3435_s29 }
0x2eea   :  { %1077 = vrot.lane.b32.xlu0 %v1069_v3, %s3435_s29 }
0x2eec   :  { %1079 = vrot.lane.b32.xlu1 %v1072_v29, %s3435_s29 }
0x2eee   :  { %1390 = vrot.lane.b32.xlu0 %v1382_v51, %s3435_s29 }
0x2ef0   :  { %1392 = vrot.lane.b32.xlu1 %v1385_v53, %s3435_s29 }
0x2ef2   :  { %1703 = vrot.lane.b32.xlu0 %v1695_v25, %s3435_s29 }
0x2ef4   :  { %1705 = vrot.lane.b32.xlu1 %v1698_v26, %s3435_s29 }
0x2ef6   :  { %2016 = vrot.lane.b32.xlu0 %v2008_v57, %s3435_s29 }
0x2ef8   :  { %2018 = vrot.lane.b32.xlu1 %v2011_v59, %s3435_s29 }
0x2efa   :  { %2329 = vrot.lane.b32.xlu0 %v2321_v11, %s3435_s29 }
0x2efc   :  { %2331 = vrot.lane.b32.xlu1 %v2324_v23, %s3435_s29 }
0x2f50   :  { %v2584_v13 = vpop.permute.xlu0 %2583 }
0x2f51   :  { %v2589_v31 = vmul.f32 %v2584_v13, %v2579_v19 }
0x2f52   :  { %v2586_v44 = vpop.permute.xlu1 %2585 }
0x2f53   :  { %v2591_v33 = vadd.f32 %v2589_v31, %v2577_v38  ;;  %v2590_v43 = vmul.f32 %v2586_v44, %v2580_v32 }
0x2f54   :  { %v453_v4 = vpop.permute.xlu0 %452 }
0x2f55   :  { %v2592_v42 = vadd.f32 %v2590_v43, %v2578_v36  ;;  %v458_v55 = vsel %vm80_vm1, %v3646_v18, %v453_v4  ;;  %v2593_v17 = vmax.f32 %v2591_v33, 0.0 }
0x2f56   :  { %460 = vst [vmem:[#allocation2] sm:$0xff] %v458_v55  ;;  %v455_v54 = vpop.permute.xlu1 %454 }
0x2f57   :  { %v2594_v58 = vmax.f32 %v2592_v42, 0.0  ;;  %v459_v47 = vsel %vm80_vm1, %v3650_v21, %v455_v54 }
0x2f58   :  { %461 = vst [vmem:[#allocation2 + $0x8] sm:$0xff] %v459_v47  ;;  %v765_v60 = vpop.permute.xlu0 %764 }
0x2f59   :  { %v2595_v62 = vpack.c.bf16 %v2594_v58, %v2593_v17  ;;  %v770_v12 = vsel %vm80_vm1, %v3746_v37, %v765_v60 }
0x2f5a   :  { %773 = vst [vmem:[#allocation2 + $0x10] sm:$0xff] %v770_v12  ;;  %v767_v52 = vpop.permute.xlu1 %766 }
0x2f5b   :  { %v771_v35 = vsel %vm80_vm1, %v3750_v40, %v767_v52  ;;  %3270 = vmatmul.mubr.msk.bf16.vlgmr.msra.gmra.mrb[72].mxu1 %vm80_vm1, %v2595_v62 }
0x2f5c   :  { %774 = vst [vmem:[#allocation2 + $0x18] sm:$0xff] %v771_v35  ;;  %v1078_v18 = vpop.permute.xlu0 %1077 }
0x2f5d   :  { %v1083_v45 = vsel %vm80_vm1, %v3836_v6, %v1078_v18 }
0x2f5e   :  { %1086 = vst [vmem:[#allocation2 + $0x20] sm:$0xff] %v1083_v45  ;;  %v1080_v21 = vpop.permute.xlu1 %1079 }
0x2f5f   :  { %v1084_v27 = vsel %vm80_vm1, %v3840_v15, %v1080_v21 }
0x2f60   :  { %1087 = vst [vmem:[#allocation2 + $0x28] sm:$0xff] %v1084_v27  ;;  %v1391_v14 = vpop.permute.xlu0 %1390 }
0x2f61   :  { %v1396_v37 = vsel %vm80_vm1, %v3926_v41, %v1391_v14 }
0x2f62   :  { %1399 = vst [vmem:[#allocation2 + $0x30] sm:$0xff] %v1396_v37  ;;  %v1393_v5 = vpop.permute.xlu1 %1392 }
0x2f63   :  { %v1397_v40 = vsel %vm80_vm1, %v3930_v48, %v1393_v5 }
0x2f64   :  { %1400 = vst [vmem:[#allocation2 + $0x38] sm:$0xff] %v1397_v40  ;;  %v1704_v63 = vpop.permute.xlu0 %1703 }
0x2f65   :  { %v1709_v6 = vsel %vm80_vm1, %v4045_v22, %v1704_v63 }
0x2f66   :  { %1712 = vst [vmem:[#allocation2 + $0x40] sm:$0xff] %v1709_v6  ;;  %v1706_v10 = vpop.permute.xlu1 %1705 }
0x2f67   :  { %v1710_v15 = vsel %vm80_vm1, %v4049_v2, %v1706_v10 }
0x2f68   :  { %1713 = vst [vmem:[#allocation2 + $0x48] sm:$0xff] %v1710_v15  ;;  %v2017_v46 = vpop.permute.xlu0 %2016 }
0x2f69   :  { %v2022_v41 = vsel %vm80_vm1, %v4174_v8, %v2017_v46 }
0x2f6a   :  { %2025 = vst [vmem:[#allocation2 + $0x50] sm:$0xff] %v2022_v41  ;;  %v2019_v1 = vpop.permute.xlu1 %2018 }
0x2f6b   :  { %v2023_v48 = vsel %vm80_vm1, %v4178_v9, %v2019_v1 }
0x2f6c   :  { %2026 = vst [vmem:[#allocation2 + $0x58] sm:$0xff] %v2023_v48  ;;  %v2330_v28 = vpop.permute.xlu0 %2329 }
0x2f6d   :  { %v2335_v22 = vsel %vm80_vm1, %v4264_v34, %v2330_v28 }
0x2f6e   :  { %2338 = vst [vmem:[#allocation2 + $0x60] sm:$0xff] %v2335_v22  ;;  %v2332_v16 = vpop.permute.xlu1 %2331 }
0x2f6f   :  { %v2336_v2 = vsel %vm80_vm1, %v4268_v39, %v2332_v16 }
0x2f70   :  { %2339 = vst [vmem:[#allocation2 + $0x68] sm:$0xff] %v2336_v2 }
0x302e   :  { %v2633_v49 = vpop.f32.mrb[72].mxu1 }
0x302f   :  { %v2634_v0 = vadd.f32 %v4329_v20, %v2633_v49  ;;  %v3271_v8 = vpop.f32.mrb[73].mxu1 }
0x3030   :  { %v2636_v50 = vpop.f32.mrb[74].mxu1 }
0x3031   :  { %v2637_v24 = vadd.f32 %v4329_v20, %v2636_v50  ;;  %2642 = vrot.lane.b32.xlu0 %v2634_v0, %s3435_s29  ;;  %v3272_v9 = vpop.f32.mrb[75].mxu1 }
0x3033   :  { %2644 = vrot.lane.b32.xlu1 %v2637_v24, %s3435_s29 }
0x30a3   :  { %v2643_v34 = vpop.permute.xlu0 %2642 }
0x30a4   :  { %v2648_v30 = vsel %vm80_vm1, %v2591_v33, %v2643_v34 }
0x30a5   :  { %2651 = vst [vmem:[#allocation2 + $0x70] sm:$0xff] %v2648_v30  ;;  %v2645_v39 = vpop.permute.xlu1 %2644 }
0x30a6   :  { %v2649_v61 = vsel %vm80_vm1, %v2592_v42, %v2645_v39 }
0x30a7   :  { %2652 = vst [vmem:[#allocation2 + $0x78] sm:$0xff] %v2649_v61 }
0x30a8   :  { %3422 = shalt.err (!%p3419_p4)
}
0x30a9   :  { %s3423_s16 = scalar_lea.hbm %s4436_s8, 2048 }
0x30aa   :  { %p3424_p5 = scmp.ne.s32.totalorder %s4436_s8, %s3423_s16  ;;  %p3427_p6 = scmp.lt.u32.totalorder %s3423_s16, %s4436_s8 }
0x30ac   :  { %p3429_p7 = pnand %p3427_p6, %p3424_p5 }
0x30ae   :  { %3432 = shalt.err (!%p3429_p7)
}
0x30af   :  { %s3443_s20 = smov 128   ;;  %s3444_s21 = smov 8  }
0x30b0   :  { %2664 = dma.vmem_to_hbm [thread:$0]  %s2659_s24, 2048, %s4436_s8, [#allocation3], %s3443_s20, %s3443_s20, %s3444_s21  }
0x30b1   :  { %3433 = dma.done.wait [#allocation3], 2048  }
0x30b2   :  { %3434 = vsyncadd [#allocation3], 4294965248 }
0x30b3   :  { %2668 = vsyncpa [#allocation3], 1 }

</bundles_post_ra>
